<compile_context>
chip_gen: v6e
topology: v6e:2x2x1
jax: 0.10.0
libtpu: 0.0.40
codegen_flags: <defaults>
</compile_context>

<pallas_src>
import math
import functools

import jax
import jax.numpy as jnp
from jax import lax
from jax.experimental import pallas as pl
from jax.experimental.pallas import tpu as pltpu


# Row indices inside the packed per-layer vector slab.
_BQ, _BK, _BV, _BO, _G1, _BE1, _G2, _BE2, _B1, _B2 = range(10)
_VEC_ROWS = 16  # padded to a sublane multiple


# ----------------------------- in-kernel helpers -----------------------------

def _layernorm(x, gamma, beta, eps=1e-5):
    # PyTorch nn.LayerNorm: biased variance over the last dim.
    mean = jnp.mean(x, axis=-1, keepdims=True)
    var = jnp.mean((x - mean) ** 2, axis=-1, keepdims=True)
    return (x - mean) * lax.rsqrt(var + eps) * gamma + beta


# --------------------------- fused forward kernel -----------------------------
# One grid step = one batch element: the (S_pad, H) activation slab runs through all
# n_blocks, then the query row goes through the final LN + classification head.

def _fused_forward_kernel(x_ref, wqkv_ref, wo_ref, w1_ref, w2_ref, vec_ref,
                          fin_ref, hw_ref, o_ref,
                          *, n_blocks, n_heads, seq_len, include_mlp,
                          layer_norm, mxu_dtype):
    x = x_ref[0]                              # (S_pad, H) f32, one batch element
    S, H = x.shape
    Dh = H // n_heads
    M = w1_ref.shape[-1]
    C_pad = hw_ref.shape[-1]

    # Causal mask generated in-kernel (VPU iota/compare, no HBM array).
    # Padded columns j >= seq_len are automatically masked for every real query row
    # i < seq_len because j > i there.
    rows = lax.broadcasted_iota(jnp.int32, (S, S), 0)
    cols = lax.broadcasted_iota(jnp.int32, (S, S), 1)
    neg_mask = jnp.where(cols <= rows, 0.0, -1e30).astype(jnp.float32)

    def vec(l, r, w):                         # packed per-layer vector row -> (1, w) f32
        return vec_ref[l, r:r + 1, :w]

    for l in range(n_blocks):                 # static unroll (tiny n_blocks)
        xc = x.astype(mxu_dtype)
        # q already carries the 1/sqrt(Dh) scale (folded into wq/bq at pack time).
        q = jnp.dot(xc, wqkv_ref[l, 0], preferred_element_type=jnp.float32) + vec(l, _BQ, H)
        k = jnp.dot(xc, wqkv_ref[l, 1], preferred_element_type=jnp.float32) + vec(l, _BK, H)
        v = jnp.dot(xc, wqkv_ref[l, 2], preferred_element_type=jnp.float32) + vec(l, _BV, H)

        # Attention accumulator initialized from residual + out-proj bias (no zero fill).
        acc = x + vec(l, _BO, H)
        for h in range(n_heads):              # static unroll over heads
            sl = slice(h * Dh, (h + 1) * Dh)
            # (S, Dh) x (S, Dh) -> (S, S), contracting on Dh (no explicit transpose).
            s = lax.dot_general(q[:, sl].astype(mxu_dtype), k[:, sl].astype(mxu_dtype),
                                (((1,), (1,)), ((), ())),
                                preferred_element_type=jnp.float32)
            s = s + neg_mask                  # mask applied in f32, after the dot
            s = s - jnp.max(s, axis=-1, keepdims=True)
            p = jnp.exp(s)
            p = p * pl.reciprocal(jnp.sum(p, axis=-1, keepdims=True), approx=True)
            head = jnp.dot(p.astype(mxu_dtype), v[:, sl].astype(mxu_dtype),
                           preferred_element_type=jnp.float32)          # (S, Dh)
            # Fold the head straight into the output projection (no concat/relayout).
            acc = acc + jnp.dot(head.astype(mxu_dtype), wo_ref[l, h],
                                preferred_element_type=jnp.float32)
        x = acc

        if layer_norm:
            x = _layernorm(x, vec(l, _G1, H), vec(l, _BE1, H))
        if include_mlp[l]:
            hmid = jnp.dot(x.astype(mxu_dtype), w1_ref[l],
                           preferred_element_type=jnp.float32) + vec(l, _B1, M)
            hmid = jnp.maximum(hmid, 0.0)                               # ReLU
            hmid = jnp.dot(hmid.astype(mxu_dtype), w2_ref[l],
                           preferred_element_type=jnp.float32) + vec(l, _B2, H)
            x = x + hmid
            if layer_norm:
                x = _layernorm(x, vec(l, _G2, H), vec(l, _BE2, H))

    # Final LayerNorm + classification head on the query row only.
    xq = x[seq_len - 1:seq_len, :]            # (1, H)
    if layer_norm:
        xq = _layernorm(xq, fin_ref[0:1, :H], fin_ref[1:2, :H])
    y = jnp.dot(xq.astype(mxu_dtype), hw_ref[...],
                preferred_element_type=jnp.float32) + fin_ref[2:3, :C_pad]   # (1, C_pad)
    o_ref[0] = jnp.broadcast_to(y, o_ref.shape[1:])


def _normalize_include_mlp(include_mlp, n_blocks):
    if include_mlp is True:
        return (True,) * n_blocks
    if include_mlp is False:
        return (False,) * n_blocks
    assert len(include_mlp) == n_blocks
    return tuple(bool(v) for v in include_mlp)


def run_fused(x, packed, *, n_blocks, n_heads, seq_len, include_mlp, layer_norm,
              mxu_dtype=jnp.bfloat16):
    B, S_pad, H = x.shape
    wqkv, wo, w1, w2 = packed["wqkv"], packed["wo"], packed["w1"], packed["w2"]
    vecs, fin, head_w = packed["vecs"], packed["fin"], packed["head_w"]
    L = n_blocks
    M = w1.shape[-1]
    VP = vecs.shape[-1]
    FP = fin.shape[-1]
    C_pad = head_w.shape[-1]
    Dh = H // n_heads

    kernel = functools.partial(
        _fused_forward_kernel,
        n_blocks=n_blocks, n_heads=n_heads, seq_len=seq_len,
        include_mlp=_normalize_include_mlp(include_mlp, n_blocks),
        layer_norm=bool(layer_norm), mxu_dtype=mxu_dtype)

    grid_spec = pltpu.PrefetchScalarGridSpec(
        num_scalar_prefetch=0,
        grid=(B,),
        in_specs=[
            pl.BlockSpec((1, S_pad, H), lambda b: (b, 0, 0)),           # activations / batch
            pl.BlockSpec((L, 3, H, H), lambda b: (0, 0, 0, 0)),         # wq|wk|wv (resident)
            pl.BlockSpec((L, n_heads, Dh, H), lambda b: (0, 0, 0, 0)),  # head-split wo
            pl.BlockSpec((L, H, M), lambda b: (0, 0, 0)),               # mlp w1
            pl.BlockSpec((L, M, H), lambda b: (0, 0, 0)),               # mlp w2
            pl.BlockSpec((L, _VEC_ROWS, VP), lambda b: (0, 0, 0)),      # packed biases/LN
            pl.BlockSpec((8, FP), lambda b: (0, 0)),                    # ln_g | ln_b | head_b
            pl.BlockSpec((H, C_pad), lambda b: (0, 0)),                 # head_w (lane-dense)
        ],
        out_specs=pl.BlockSpec((1, 8, C_pad), lambda b: (b, 0, 0)),
    )
    return pl.pallas_call(
        kernel,
        out_shape=jax.ShapeDtypeStruct((B, 8, C_pad), jnp.float32),
        grid_spec=grid_spec,
        compiler_params=pltpu.CompilerParams(
            dimension_semantics=("parallel",),      # megacore split over batch on v7x
            vmem_limit_bytes=32 * 1024 * 1024),
    )(x, wqkv, wo, w1, w2, vecs, fin, head_w)


# ------------------------------ parameter packing ------------------------------

def pack_params(params, cfg, mxu_dtype=jnp.bfloat16):
    H, M, C, L = cfg["h_dim"], cfg["mlp_dim"], cfg["num_classes"], cfg["n_blocks"]
    nh = cfg["n_heads"]
    Dh = H // nh
    blocks = params["blocks"]
    scale = 1.0 / math.sqrt(Dh)

    # Fold the attention scale into the query projection (zero kernel cost).
    wq = blocks["wq"] * scale
    bq = blocks["bq"] * scale

    wqkv = jnp.stack([wq, blocks["wk"], blocks["wv"]], axis=1).astype(mxu_dtype)  # (L,3,H,H)
    wo = blocks["wo"].reshape(L, nh, Dh, H).astype(mxu_dtype)                     # head-split

    VP = max(H, M)

    def row(v):                                   # (L,1,w) -> (L, VP), zero-padded
        v2 = v.reshape(L, -1)
        return jnp.pad(v2, ((0, 0), (0, VP - v2.shape[-1])))

    rows = [None] * 10
    rows[_BQ], rows[_BK], rows[_BV], rows[_BO] = row(bq), row(blocks["bk"]), row(blocks["bv"]), row(blocks["bo"])
    rows[_G1], rows[_BE1] = row(blocks["g1"]), row(blocks["be1"])
    rows[_G2], rows[_BE2] = row(blocks["g2"]), row(blocks["be2"])
    rows[_B1], rows[_B2] = row(blocks["b1"]), row(blocks["b2"])
    vecs = jnp.stack(rows, axis=1)                                  # (L, 10, VP)
    vecs = jnp.pad(vecs, ((0, 0), (0, _VEC_ROWS - vecs.shape[1]), (0, 0))).astype(jnp.float32)

    C_pad = ((C + 127) // 128) * 128                                # lane-dense output
    head_w = jnp.pad(params["head_w"], ((0, 0), (0, C_pad - C))).astype(mxu_dtype)

    FP = max(H, C_pad)

    def frow(v):
        v = v.reshape(-1)
        return jnp.pad(v, (0, FP - v.shape[0]))

    fin = jnp.stack([frow(params["ln_g"]), frow(params["ln_b"]), frow(params["head_b"])], 0)
    fin = jnp.pad(fin, ((0, 8 - fin.shape[0]), (0, 0))).astype(jnp.float32)

    return dict(wqkv=wqkv, wo=wo,
                w1=blocks["w1"].astype(mxu_dtype), w2=blocks["w2"].astype(mxu_dtype),
                vecs=vecs, fin=fin, head_w=head_w)


# ------------------------------ full forward ----------------------------------

def transformer_forward(packed, stimuli, labels, pos_key, cfg):
    B, T, D = stimuli.shape
    P = cfg["max_T"]
    H = cfg["h_dim"]
    assert H == D + P, "h_dim must equal token_dim + max_T"
    assert H % cfg["n_heads"] == 0, "h_dim must be divisible by n_heads"
    seq_len = (T - 1) * 2 + 1
    S_pad = ((seq_len + 7) // 8) * 8            # sublane-aligned padded sequence length

    # one-hot label "embeddings" (num_classes = token_dim D, as in the reference)
    emb_labels = jax.nn.one_hot(labels, D, dtype=jnp.float32)        # (B, T-1, D)

    # positional one-hot embeddings with a (deterministic) random start offset
    start = jax.random.randint(pos_key, (B,), 0, P - seq_len + 1)
    positions = start[:, None] + jnp.arange(seq_len)[None, :]        # (B, seq_len)
    pos_emb = jax.nn.one_hot(positions, P, dtype=jnp.float32)        # (B, seq_len, P)

    # interleave context stimuli with label embeddings, append the query stimulus
    ctx = stimuli[:, :-1, :]                                         # (B, T-1, D)
    h = jnp.concatenate([ctx, emb_labels], axis=1)                   # (B, 2(T-1), D)
    idx = jnp.arange(2 * (T - 1)).reshape(2, T - 1).T.reshape(-1)
    h = h[:, idx, :]
    h = jnp.concatenate([h, stimuli[:, -1:, :]], axis=1)             # (B, seq_len, D)
    h = jnp.concatenate([h, pos_emb], axis=-1)                       # (B, seq_len, H)
    h = jnp.pad(h, ((0, 0), (0, S_pad - seq_len), (0, 0)))           # (B, S_pad, H)

    logits = run_fused(h, packed,
                       n_blocks=cfg["n_blocks"], n_heads=cfg["n_heads"],
                       seq_len=seq_len, include_mlp=cfg["include_mlp"],
                       layer_norm=cfg["layer_norm"],
                       mxu_dtype=cfg.get("mxu_dtype", jnp.bfloat16))  # (B, 8, C_pad)

    # query prediction = head output of the last real token, un-padded
    return logits[:, 0, :cfg["num_classes"]]


# ------------------------------ parameter init --------------------------------

def init_params(key, cfg):
    H, M, C, L = cfg["h_dim"], cfg["mlp_dim"], cfg["num_classes"], cfg["n_blocks"]

    def linear(k, fan_in, fan_out):
        k1, k2 = jax.random.split(k)
        bound = 1.0 / math.sqrt(fan_in)
        w = jax.random.uniform(k1, (fan_in, fan_out), jnp.float32, -bound, bound)
        b = jax.random.uniform(k2, (1, fan_out), jnp.float32, -bound, bound)
        return w, b

    names = ["wq", "bq", "wk", "bk", "wv", "bv", "wo", "bo",
             "g1", "be1", "w1", "b1", "w2", "b2", "g2", "be2"]
    acc = {n: [] for n in names}

    keys = jax.random.split(key, L + 1)
    for bkey in keys[:-1]:
        ks = jax.random.split(bkey, 6)
        wq, bq = linear(ks[0], H, H)
        wk, bk = linear(ks[1], H, H)
        wv, bv = linear(ks[2], H, H)
        wo, bo = linear(ks[3], H, H)
        w1, b1 = linear(ks[4], H, M)
        w2, b2 = linear(ks[5], M, H)
        vals = dict(wq=wq, bq=bq, wk=wk, bk=bk, wv=wv, bv=bv, wo=wo, bo=bo,
                    g1=jnp.ones((1, H), jnp.float32), be1=jnp.zeros((1, H), jnp.float32),
                    w1=w1, b1=b1, w2=w2, b2=b2,
                    g2=jnp.ones((1, H), jnp.float32), be2=jnp.zeros((1, H), jnp.float32))
        for n in names:
            acc[n].append(vals[n])

    blocks = {n: jnp.stack(v) for n, v in acc.items()}   # stacked (L, ...) weights
    head_w, head_b = linear(keys[-1], H, C)
    return dict(blocks=blocks,
                ln_g=jnp.ones((1, H), jnp.float32), ln_b=jnp.zeros((1, H), jnp.float32),
                head_w=head_w, head_b=head_b)


# ----------------------------------- main --------------------------------------

if __name__ == "__main__":
    # small config: token_dim=16, max_T=16 -> h_dim = token_dim + max_T = 32
    D, P, T, B = 16, 16, 5, 2
    cfg = dict(token_dim=D, n_blocks=2, h_dim=D + P, max_T=P, n_heads=4,
               drop_p=0.0, mlp_dim=64, num_classes=D,
               layer_norm=True, include_mlp=[True, True],
               mxu_dtype=jnp.bfloat16)

    key = jax.random.PRNGKey(0)
    k_params, k_stim, k_lab, k_pos = jax.random.split(key, 4)

    params = init_params(k_params, cfg)
    packed = pack_params(params, cfg, mxu_dtype=cfg["mxu_dtype"])

    stimuli = jax.random.normal(k_stim, (B, T, D), jnp.float32)      # (B, T, token_dim)
    labels = jax.random.randint(k_lab, (B, T - 1), 0, D)             # context labels

    fwd = jax.jit(functools.partial(transformer_forward, cfg=cfg))
    out = fwd(packed, stimuli, labels, k_pos)
    out = jax.block_until_ready(out)
    assert out.shape == (B, cfg["num_classes"])
    assert bool(jnp.all(jnp.isfinite(out)))
    print("KERNEL_OK")
</pallas_src>

<mosaic_0001>
module attributes {stable_mosaic.version = 11 : i64} {
  func.func @_fused_forward_kernel(%arg0: i32, %arg1: memref<1x16x32xf32, #tpu.memory_space<vmem>>, %arg2: memref<2x3x32x32xbf16, #tpu.memory_space<vmem>>, %arg3: memref<2x4x8x32xbf16, #tpu.memory_space<vmem>>, %arg4: memref<2x32x64xbf16, #tpu.memory_space<vmem>>, %arg5: memref<2x64x32xbf16, #tpu.memory_space<vmem>>, %arg6: memref<2x16x64xf32, #tpu.memory_space<vmem>>, %arg7: memref<8x128xf32, #tpu.memory_space<vmem>>, %arg8: memref<32x128xbf16, #tpu.memory_space<vmem>>, %arg9: memref<1x8x128xf32, #tpu.memory_space<vmem>>) attributes {dimension_semantics = [#tpu.dimension_semantics<parallel>], iteration_bounds = array<i64: 2>, scalar_prefetch = 0 : i64, scratch_operands = 0 : i64, tpu.core_type = #tpu.core_type<tc>, window_params = [{transform_indices = @transform_0, window_bounds = array<i64: 1, 16, 32>}, {pipeline_mode = #tpu.pipeline_mode<synchronous>, transform_indices = @transform_1, window_bounds = array<i64: 2, 3, 32, 32>}, {pipeline_mode = #tpu.pipeline_mode<synchronous>, transform_indices = @transform_2, window_bounds = array<i64: 2, 4, 8, 32>}, {pipeline_mode = #tpu.pipeline_mode<synchronous>, transform_indices = @transform_3, window_bounds = array<i64: 2, 32, 64>}, {pipeline_mode = #tpu.pipeline_mode<synchronous>, transform_indices = @transform_4, window_bounds = array<i64: 2, 64, 32>}, {pipeline_mode = #tpu.pipeline_mode<synchronous>, transform_indices = @transform_5, window_bounds = array<i64: 2, 16, 64>}, {pipeline_mode = #tpu.pipeline_mode<synchronous>, transform_indices = @transform_6, window_bounds = array<i64: 8, 128>}, {pipeline_mode = #tpu.pipeline_mode<synchronous>, transform_indices = @transform_7, window_bounds = array<i64: 32, 128>}, {transform_indices = @transform_8, window_bounds = array<i64: 1, 8, 128>}]} {
    %c0 = arith.constant 0 : index
    %c0_0 = arith.constant 0 : index
    %c0_1 = arith.constant 0 : index
    %0 = vector.load %arg1[%c0, %c0_0, %c0_1] : memref<1x16x32xf32, #tpu.memory_space<vmem>>, vector<1x16x32xf32>
    %1 = vector.shape_cast %0 : vector<1x16x32xf32> to vector<16x32xf32>
    %2 = tpu.iota {dimensions = array<i32: 0>} : vector<16x16xi32>
    %3 = tpu.iota {dimensions = array<i32: 1>} : vector<16x16xi32>
    %4 = arith.cmpi sle, %3, %2 : vector<16x16xi32>
    %cst = arith.constant 0.000000e+00 : f32
    %cst_2 = arith.constant -1.000000e+30 : f32
    %5 = vector.broadcast %cst : f32 to vector<16x16xf32>
    %6 = vector.broadcast %cst_2 : f32 to vector<16x16xf32>
    %7 = arith.select %4, %5, %6 : vector<16x16xi1>, vector<16x16xf32>
    %8 = arith.truncf %1 : vector<16x32xf32> to vector<16x32xbf16>
    %c0_3 = arith.constant 0 : index
    %c0_4 = arith.constant 0 : index
    %c0_5 = arith.constant 0 : index
    %c0_6 = arith.constant 0 : index
    %9 = vector.load %arg2[%c0_3, %c0_4, %c0_5, %c0_6] : memref<2x3x32x32xbf16, #tpu.memory_space<vmem>>, vector<1x1x32x32xbf16>
    %10 = vector.shape_cast %9 : vector<1x1x32x32xbf16> to vector<32x32xbf16>
    %cst_7 = arith.constant dense<0.000000e+00> : vector<16x32xf32>
    %11 = tpu.matmul %8, %10, %cst_7 {dimension_numbers = #tpu.dot_dimension_numbers<[1], [0], [0], [1], [0, 0, 1, 1], [], []>} : vector<16x32xbf16>, vector<32x32xbf16>, vector<16x32xf32> -> vector<16x32xf32>
    %c0_8 = arith.constant 0 : index
    %c0_9 = arith.constant 0 : index
    %c0_10 = arith.constant 0 : index
    %12 = vector.load %arg6[%c0_8, %c0_9, %c0_10] : memref<2x16x64xf32, #tpu.memory_space<vmem>>, vector<1x1x32xf32>
    %13 = vector.shape_cast %12 : vector<1x1x32xf32> to vector<1x32xf32>
    %14 = vector.broadcast %13 : vector<1x32xf32> to vector<16x32xf32>
    %15 = arith.addf %11, %14 : vector<16x32xf32>
    %c0_11 = arith.constant 0 : index
    %c1 = arith.constant 1 : index
    %c0_12 = arith.constant 0 : index
    %c0_13 = arith.constant 0 : index
    %16 = vector.load %arg2[%c0_11, %c1, %c0_12, %c0_13] : memref<2x3x32x32xbf16, #tpu.memory_space<vmem>>, vector<1x1x32x32xbf16>
    %17 = vector.shape_cast %16 : vector<1x1x32x32xbf16> to vector<32x32xbf16>
    %cst_14 = arith.constant dense<0.000000e+00> : vector<16x32xf32>
    %18 = tpu.matmul %8, %17, %cst_14 {dimension_numbers = #tpu.dot_dimension_numbers<[1], [0], [0], [1], [0, 0, 1, 1], [], []>} : vector<16x32xbf16>, vector<32x32xbf16>, vector<16x32xf32> -> vector<16x32xf32>
    %c0_15 = arith.constant 0 : index
    %c1_16 = arith.constant 1 : index
    %c0_17 = arith.constant 0 : index
    %19 = vector.load %arg6[%c0_15, %c1_16, %c0_17] : memref<2x16x64xf32, #tpu.memory_space<vmem>>, vector<1x1x32xf32>
    %20 = vector.shape_cast %19 : vector<1x1x32xf32> to vector<1x32xf32>
    %21 = vector.broadcast %20 : vector<1x32xf32> to vector<16x32xf32>
    %22 = arith.addf %18, %21 : vector<16x32xf32>
    %c0_18 = arith.constant 0 : index
    %c2 = arith.constant 2 : index
    %c0_19 = arith.constant 0 : index
    %c0_20 = arith.constant 0 : index
    %23 = vector.load %arg2[%c0_18, %c2, %c0_19, %c0_20] : memref<2x3x32x32xbf16, #tpu.memory_space<vmem>>, vector<1x1x32x32xbf16>
    %24 = vector.shape_cast %23 : vector<1x1x32x32xbf16> to vector<32x32xbf16>
    %cst_21 = arith.constant dense<0.000000e+00> : vector<16x32xf32>
    %25 = tpu.matmul %8, %24, %cst_21 {dimension_numbers = #tpu.dot_dimension_numbers<[1], [0], [0], [1], [0, 0, 1, 1], [], []>} : vector<16x32xbf16>, vector<32x32xbf16>, vector<16x32xf32> -> vector<16x32xf32>
    %c0_22 = arith.constant 0 : index
    %c2_23 = arith.constant 2 : index
    %c0_24 = arith.constant 0 : index
    %26 = vector.load %arg6[%c0_22, %c2_23, %c0_24] : memref<2x16x64xf32, #tpu.memory_space<vmem>>, vector<1x1x32xf32>
    %27 = vector.shape_cast %26 : vector<1x1x32xf32> to vector<1x32xf32>
    %28 = vector.broadcast %27 : vector<1x32xf32> to vector<16x32xf32>
    %29 = arith.addf %25, %28 : vector<16x32xf32>
    %c0_25 = arith.constant 0 : index
    %c3 = arith.constant 3 : index
    %c0_26 = arith.constant 0 : index
    %30 = vector.load %arg6[%c0_25, %c3, %c0_26] : memref<2x16x64xf32, #tpu.memory_space<vmem>>, vector<1x1x32xf32>
    %31 = vector.shape_cast %30 : vector<1x1x32xf32> to vector<1x32xf32>
    %32 = vector.broadcast %31 : vector<1x32xf32> to vector<16x32xf32>
    %33 = arith.addf %1, %32 : vector<16x32xf32>
    %34 = vector.extract_strided_slice %15 {offsets = [0, 0], sizes = [16, 8], strides = [1, 1]} : vector<16x32xf32> to vector<16x8xf32>
    %35 = arith.truncf %34 : vector<16x8xf32> to vector<16x8xbf16>
    %36 = vector.extract_strided_slice %22 {offsets = [0, 0], sizes = [16, 8], strides = [1, 1]} : vector<16x32xf32> to vector<16x8xf32>
    %37 = arith.truncf %36 : vector<16x8xf32> to vector<16x8xbf16>
    %cst_27 = arith.constant dense<0.000000e+00> : vector<16x16xf32>
    %38 = tpu.matmul %35, %37, %cst_27 {dimension_numbers = #tpu.dot_dimension_numbers<[1], [1], [0], [0], [0, 0, 1, 0], [], []>} : vector<16x8xbf16>, vector<16x8xbf16>, vector<16x16xf32> -> vector<16x16xf32>
    %39 = arith.addf %38, %7 : vector<16x16xf32>
    %cst_28 = arith.constant dense<0xFF800000> : vector<16xf32>
    %40 = vector.multi_reduction <maximumf>, %39, %cst_28 [1] : vector<16x16xf32> to vector<16xf32>
    %41 = vector.shape_cast %40 : vector<16xf32> to vector<16x1xf32>
    %42 = vector.broadcast %41 : vector<16x1xf32> to vector<16x16xf32>
    %43 = arith.subf %39, %42 : vector<16x16xf32>
    %44 = math.exp %43 : vector<16x16xf32>
    %cst_29 = arith.constant dense<0.000000e+00> : vector<16xf32>
    %45 = vector.multi_reduction <add>, %44, %cst_29 [1] : vector<16x16xf32> to vector<16xf32>
    %46 = vector.shape_cast %45 : vector<16xf32> to vector<16x1xf32>
    %47 = tpu.reciprocal %46 {approx = true} : vector<16x1xf32> -> vector<16x1xf32>
    %48 = vector.broadcast %47 : vector<16x1xf32> to vector<16x16xf32>
    %49 = arith.mulf %44, %48 : vector<16x16xf32>
    %50 = arith.truncf %49 : vector<16x16xf32> to vector<16x16xbf16>
    %51 = vector.extract_strided_slice %29 {offsets = [0, 0], sizes = [16, 8], strides = [1, 1]} : vector<16x32xf32> to vector<16x8xf32>
    %52 = arith.truncf %51 : vector<16x8xf32> to vector<16x8xbf16>
    %cst_30 = arith.constant dense<0.000000e+00> : vector<16x8xf32>
    %53 = tpu.matmul %50, %52, %cst_30 {dimension_numbers = #tpu.dot_dimension_numbers<[1], [0], [0], [1], [0, 0, 1, 1], [], []>} : vector<16x16xbf16>, vector<16x8xbf16>, vector<16x8xf32> -> vector<16x8xf32>
    %54 = arith.truncf %53 : vector<16x8xf32> to vector<16x8xbf16>
    %c0_31 = arith.constant 0 : index
    %c0_32 = arith.constant 0 : index
    %c0_33 = arith.constant 0 : index
    %c0_34 = arith.constant 0 : index
    %55 = vector.load %arg3[%c0_31, %c0_32, %c0_33, %c0_34] : memref<2x4x8x32xbf16, #tpu.memory_space<vmem>>, vector<1x1x8x32xbf16>
    %56 = vector.shape_cast %55 : vector<1x1x8x32xbf16> to vector<8x32xbf16>
    %cst_35 = arith.constant dense<0.000000e+00> : vector<16x32xf32>
    %57 = tpu.matmul %54, %56, %cst_35 {dimension_numbers = #tpu.dot_dimension_numbers<[1], [0], [0], [1], [0, 0, 1, 1], [], []>} : vector<16x8xbf16>, vector<8x32xbf16>, vector<16x32xf32> -> vector<16x32xf32>
    %58 = arith.addf %33, %57 : vector<16x32xf32>
    %59 = vector.extract_strided_slice %15 {offsets = [0, 8], sizes = [16, 8], strides = [1, 1]} : vector<16x32xf32> to vector<16x8xf32>
    %60 = arith.truncf %59 : vector<16x8xf32> to vector<16x8xbf16>
    %61 = vector.extract_strided_slice %22 {offsets = [0, 8], sizes = [16, 8], strides = [1, 1]} : vector<16x32xf32> to vector<16x8xf32>
    %62 = arith.truncf %61 : vector<16x8xf32> to vector<16x8xbf16>
    %cst_36 = arith.constant dense<0.000000e+00> : vector<16x16xf32>
    %63 = tpu.matmul %60, %62, %cst_36 {dimension_numbers = #tpu.dot_dimension_numbers<[1], [1], [0], [0], [0, 0, 1, 0], [], []>} : vector<16x8xbf16>, vector<16x8xbf16>, vector<16x16xf32> -> vector<16x16xf32>
    %64 = arith.addf %63, %7 : vector<16x16xf32>
    %cst_37 = arith.constant dense<0xFF800000> : vector<16xf32>
    %65 = vector.multi_reduction <maximumf>, %64, %cst_37 [1] : vector<16x16xf32> to vector<16xf32>
    %66 = vector.shape_cast %65 : vector<16xf32> to vector<16x1xf32>
    %67 = vector.broadcast %66 : vector<16x1xf32> to vector<16x16xf32>
    %68 = arith.subf %64, %67 : vector<16x16xf32>
    %69 = math.exp %68 : vector<16x16xf32>
    %cst_38 = arith.constant dense<0.000000e+00> : vector<16xf32>
    %70 = vector.multi_reduction <add>, %69, %cst_38 [1] : vector<16x16xf32> to vector<16xf32>
    %71 = vector.shape_cast %70 : vector<16xf32> to vector<16x1xf32>
    %72 = tpu.reciprocal %71 {approx = true} : vector<16x1xf32> -> vector<16x1xf32>
    %73 = vector.broadcast %72 : vector<16x1xf32> to vector<16x16xf32>
    %74 = arith.mulf %69, %73 : vector<16x16xf32>
    %75 = arith.truncf %74 : vector<16x16xf32> to vector<16x16xbf16>
    %76 = vector.extract_strided_slice %29 {offsets = [0, 8], sizes = [16, 8], strides = [1, 1]} : vector<16x32xf32> to vector<16x8xf32>
    %77 = arith.truncf %76 : vector<16x8xf32> to vector<16x8xbf16>
    %cst_39 = arith.constant dense<0.000000e+00> : vector<16x8xf32>
    %78 = tpu.matmul %75, %77, %cst_39 {dimension_numbers = #tpu.dot_dimension_numbers<[1], [0], [0], [1], [0, 0, 1, 1], [], []>} : vector<16x16xbf16>, vector<16x8xbf16>, vector<16x8xf32> -> vector<16x8xf32>
    %79 = arith.truncf %78 : vector<16x8xf32> to vector<16x8xbf16>
    %c0_40 = arith.constant 0 : index
    %c1_41 = arith.constant 1 : index
    %c0_42 = arith.constant 0 : index
    %c0_43 = arith.constant 0 : index
    %80 = vector.load %arg3[%c0_40, %c1_41, %c0_42, %c0_43] : memref<2x4x8x32xbf16, #tpu.memory_space<vmem>>, vector<1x1x8x32xbf16>
    %81 = vector.shape_cast %80 : vector<1x1x8x32xbf16> to vector<8x32xbf16>
    %cst_44 = arith.constant dense<0.000000e+00> : vector<16x32xf32>
    %82 = tpu.matmul %79, %81, %cst_44 {dimension_numbers = #tpu.dot_dimension_numbers<[1], [0], [0], [1], [0, 0, 1, 1], [], []>} : vector<16x8xbf16>, vector<8x32xbf16>, vector<16x32xf32> -> vector<16x32xf32>
    %83 = arith.addf %58, %82 : vector<16x32xf32>
    %84 = vector.extract_strided_slice %15 {offsets = [0, 16], sizes = [16, 8], strides = [1, 1]} : vector<16x32xf32> to vector<16x8xf32>
    %85 = arith.truncf %84 : vector<16x8xf32> to vector<16x8xbf16>
    %86 = vector.extract_strided_slice %22 {offsets = [0, 16], sizes = [16, 8], strides = [1, 1]} : vector<16x32xf32> to vector<16x8xf32>
    %87 = arith.truncf %86 : vector<16x8xf32> to vector<16x8xbf16>
    %cst_45 = arith.constant dense<0.000000e+00> : vector<16x16xf32>
    %88 = tpu.matmul %85, %87, %cst_45 {dimension_numbers = #tpu.dot_dimension_numbers<[1], [1], [0], [0], [0, 0, 1, 0], [], []>} : vector<16x8xbf16>, vector<16x8xbf16>, vector<16x16xf32> -> vector<16x16xf32>
    %89 = arith.addf %88, %7 : vector<16x16xf32>
    %cst_46 = arith.constant dense<0xFF800000> : vector<16xf32>
    %90 = vector.multi_reduction <maximumf>, %89, %cst_46 [1] : vector<16x16xf32> to vector<16xf32>
    %91 = vector.shape_cast %90 : vector<16xf32> to vector<16x1xf32>
    %92 = vector.broadcast %91 : vector<16x1xf32> to vector<16x16xf32>
    %93 = arith.subf %89, %92 : vector<16x16xf32>
    %94 = math.exp %93 : vector<16x16xf32>
    %cst_47 = arith.constant dense<0.000000e+00> : vector<16xf32>
    %95 = vector.multi_reduction <add>, %94, %cst_47 [1] : vector<16x16xf32> to vector<16xf32>
    %96 = vector.shape_cast %95 : vector<16xf32> to vector<16x1xf32>
    %97 = tpu.reciprocal %96 {approx = true} : vector<16x1xf32> -> vector<16x1xf32>
    %98 = vector.broadcast %97 : vector<16x1xf32> to vector<16x16xf32>
    %99 = arith.mulf %94, %98 : vector<16x16xf32>
    %100 = arith.truncf %99 : vector<16x16xf32> to vector<16x16xbf16>
    %101 = vector.extract_strided_slice %29 {offsets = [0, 16], sizes = [16, 8], strides = [1, 1]} : vector<16x32xf32> to vector<16x8xf32>
    %102 = arith.truncf %101 : vector<16x8xf32> to vector<16x8xbf16>
    %cst_48 = arith.constant dense<0.000000e+00> : vector<16x8xf32>
    %103 = tpu.matmul %100, %102, %cst_48 {dimension_numbers = #tpu.dot_dimension_numbers<[1], [0], [0], [1], [0, 0, 1, 1], [], []>} : vector<16x16xbf16>, vector<16x8xbf16>, vector<16x8xf32> -> vector<16x8xf32>
    %104 = arith.truncf %103 : vector<16x8xf32> to vector<16x8xbf16>
    %c0_49 = arith.constant 0 : index
    %c2_50 = arith.constant 2 : index
    %c0_51 = arith.constant 0 : index
    %c0_52 = arith.constant 0 : index
    %105 = vector.load %arg3[%c0_49, %c2_50, %c0_51, %c0_52] : memref<2x4x8x32xbf16, #tpu.memory_space<vmem>>, vector<1x1x8x32xbf16>
    %106 = vector.shape_cast %105 : vector<1x1x8x32xbf16> to vector<8x32xbf16>
    %cst_53 = arith.constant dense<0.000000e+00> : vector<16x32xf32>
    %107 = tpu.matmul %104, %106, %cst_53 {dimension_numbers = #tpu.dot_dimension_numbers<[1], [0], [0], [1], [0, 0, 1, 1], [], []>} : vector<16x8xbf16>, vector<8x32xbf16>, vector<16x32xf32> -> vector<16x32xf32>
    %108 = arith.addf %83, %107 : vector<16x32xf32>
    %109 = vector.extract_strided_slice %15 {offsets = [0, 24], sizes = [16, 8], strides = [1, 1]} : vector<16x32xf32> to vector<16x8xf32>
    %110 = arith.truncf %109 : vector<16x8xf32> to vector<16x8xbf16>
    %111 = vector.extract_strided_slice %22 {offsets = [0, 24], sizes = [16, 8], strides = [1, 1]} : vector<16x32xf32> to vector<16x8xf32>
    %112 = arith.truncf %111 : vector<16x8xf32> to vector<16x8xbf16>
    %cst_54 = arith.constant dense<0.000000e+00> : vector<16x16xf32>
    %113 = tpu.matmul %110, %112, %cst_54 {dimension_numbers = #tpu.dot_dimension_numbers<[1], [1], [0], [0], [0, 0, 1, 0], [], []>} : vector<16x8xbf16>, vector<16x8xbf16>, vector<16x16xf32> -> vector<16x16xf32>
    %114 = arith.addf %113, %7 : vector<16x16xf32>
    %cst_55 = arith.constant dense<0xFF800000> : vector<16xf32>
    %115 = vector.multi_reduction <maximumf>, %114, %cst_55 [1] : vector<16x16xf32> to vector<16xf32>
    %116 = vector.shape_cast %115 : vector<16xf32> to vector<16x1xf32>
    %117 = vector.broadcast %116 : vector<16x1xf32> to vector<16x16xf32>
    %118 = arith.subf %114, %117 : vector<16x16xf32>
    %119 = math.exp %118 : vector<16x16xf32>
    %cst_56 = arith.constant dense<0.000000e+00> : vector<16xf32>
    %120 = vector.multi_reduction <add>, %119, %cst_56 [1] : vector<16x16xf32> to vector<16xf32>
    %121 = vector.shape_cast %120 : vector<16xf32> to vector<16x1xf32>
    %122 = tpu.reciprocal %121 {approx = true} : vector<16x1xf32> -> vector<16x1xf32>
    %123 = vector.broadcast %122 : vector<16x1xf32> to vector<16x16xf32>
    %124 = arith.mulf %119, %123 : vector<16x16xf32>
    %125 = arith.truncf %124 : vector<16x16xf32> to vector<16x16xbf16>
    %126 = vector.extract_strided_slice %29 {offsets = [0, 24], sizes = [16, 8], strides = [1, 1]} : vector<16x32xf32> to vector<16x8xf32>
    %127 = arith.truncf %126 : vector<16x8xf32> to vector<16x8xbf16>
    %cst_57 = arith.constant dense<0.000000e+00> : vector<16x8xf32>
    %128 = tpu.matmul %125, %127, %cst_57 {dimension_numbers = #tpu.dot_dimension_numbers<[1], [0], [0], [1], [0, 0, 1, 1], [], []>} : vector<16x16xbf16>, vector<16x8xbf16>, vector<16x8xf32> -> vector<16x8xf32>
    %129 = arith.truncf %128 : vector<16x8xf32> to vector<16x8xbf16>
    %c0_58 = arith.constant 0 : index
    %c3_59 = arith.constant 3 : index
    %c0_60 = arith.constant 0 : index
    %c0_61 = arith.constant 0 : index
    %130 = vector.load %arg3[%c0_58, %c3_59, %c0_60, %c0_61] : memref<2x4x8x32xbf16, #tpu.memory_space<vmem>>, vector<1x1x8x32xbf16>
    %131 = vector.shape_cast %130 : vector<1x1x8x32xbf16> to vector<8x32xbf16>
    %cst_62 = arith.constant dense<0.000000e+00> : vector<16x32xf32>
    %132 = tpu.matmul %129, %131, %cst_62 {dimension_numbers = #tpu.dot_dimension_numbers<[1], [0], [0], [1], [0, 0, 1, 1], [], []>} : vector<16x8xbf16>, vector<8x32xbf16>, vector<16x32xf32> -> vector<16x32xf32>
    %133 = arith.addf %108, %132 : vector<16x32xf32>
    %c0_63 = arith.constant 0 : index
    %c4 = arith.constant 4 : index
    %c0_64 = arith.constant 0 : index
    %134 = vector.load %arg6[%c0_63, %c4, %c0_64] : memref<2x16x64xf32, #tpu.memory_space<vmem>>, vector<1x1x32xf32>
    %135 = vector.shape_cast %134 : vector<1x1x32xf32> to vector<1x32xf32>
    %c0_65 = arith.constant 0 : index
    %c5 = arith.constant 5 : index
    %c0_66 = arith.constant 0 : index
    %136 = vector.load %arg6[%c0_65, %c5, %c0_66] : memref<2x16x64xf32, #tpu.memory_space<vmem>>, vector<1x1x32xf32>
    %137 = vector.shape_cast %136 : vector<1x1x32xf32> to vector<1x32xf32>
    %cst_67 = arith.constant dense<0.000000e+00> : vector<16xf32>
    %138 = vector.multi_reduction <add>, %133, %cst_67 [1] : vector<16x32xf32> to vector<16xf32>
    %139 = vector.shape_cast %138 : vector<16xf32> to vector<16x1xf32>
    %cst_68 = arith.constant 3.200000e+01 : f32
    %140 = vector.broadcast %cst_68 : f32 to vector<16x1xf32>
    %141 = arith.divf %139, %140 : vector<16x1xf32>
    %142 = vector.broadcast %141 : vector<16x1xf32> to vector<16x32xf32>
    %143 = arith.subf %133, %142 : vector<16x32xf32>
    %144 = arith.mulf %143, %143 : vector<16x32xf32>
    %cst_69 = arith.constant dense<0.000000e+00> : vector<16xf32>
    %145 = vector.multi_reduction <add>, %144, %cst_69 [1] : vector<16x32xf32> to vector<16xf32>
    %146 = vector.shape_cast %145 : vector<16xf32> to vector<16x1xf32>
    %cst_70 = arith.constant 3.200000e+01 : f32
    %147 = vector.broadcast %cst_70 : f32 to vector<16x1xf32>
    %148 = arith.divf %146, %147 : vector<16x1xf32>
    %149 = vector.broadcast %141 : vector<16x1xf32> to vector<16x32xf32>
    %150 = arith.subf %133, %149 : vector<16x32xf32>
    %cst_71 = arith.constant 9.99999974E-6 : f32
    %151 = vector.broadcast %cst_71 : f32 to vector<16x1xf32>
    %152 = arith.addf %148, %151 : vector<16x1xf32>
    %153 = math.rsqrt %152 : vector<16x1xf32>
    %154 = vector.broadcast %153 : vector<16x1xf32> to vector<16x32xf32>
    %155 = arith.mulf %150, %154 : vector<16x32xf32>
    %156 = vector.broadcast %135 : vector<1x32xf32> to vector<16x32xf32>
    %157 = arith.mulf %155, %156 : vector<16x32xf32>
    %158 = vector.broadcast %137 : vector<1x32xf32> to vector<16x32xf32>
    %159 = arith.addf %157, %158 : vector<16x32xf32>
    %160 = arith.truncf %159 : vector<16x32xf32> to vector<16x32xbf16>
    %c0_72 = arith.constant 0 : index
    %c0_73 = arith.constant 0 : index
    %c0_74 = arith.constant 0 : index
    %161 = vector.load %arg4[%c0_72, %c0_73, %c0_74] : memref<2x32x64xbf16, #tpu.memory_space<vmem>>, vector<1x32x64xbf16>
    %162 = vector.shape_cast %161 : vector<1x32x64xbf16> to vector<32x64xbf16>
    %cst_75 = arith.constant dense<0.000000e+00> : vector<16x64xf32>
    %163 = tpu.matmul %160, %162, %cst_75 {dimension_numbers = #tpu.dot_dimension_numbers<[1], [0], [0], [1], [0, 0, 1, 1], [], []>} : vector<16x32xbf16>, vector<32x64xbf16>, vector<16x64xf32> -> vector<16x64xf32>
    %c0_76 = arith.constant 0 : index
    %c8 = arith.constant 8 : index
    %c0_77 = arith.constant 0 : index
    %164 = vector.load %arg6[%c0_76, %c8, %c0_77] : memref<2x16x64xf32, #tpu.memory_space<vmem>>, vector<1x1x64xf32>
    %165 = vector.shape_cast %164 : vector<1x1x64xf32> to vector<1x64xf32>
    %166 = vector.broadcast %165 : vector<1x64xf32> to vector<16x64xf32>
    %167 = arith.addf %163, %166 : vector<16x64xf32>
    %cst_78 = arith.constant 0.000000e+00 : f32
    %168 = vector.broadcast %cst_78 : f32 to vector<16x64xf32>
    %169 = arith.maximumf %167, %168 : vector<16x64xf32>
    %170 = arith.truncf %169 : vector<16x64xf32> to vector<16x64xbf16>
    %c0_79 = arith.constant 0 : index
    %c0_80 = arith.constant 0 : index
    %c0_81 = arith.constant 0 : index
    %171 = vector.load %arg5[%c0_79, %c0_80, %c0_81] : memref<2x64x32xbf16, #tpu.memory_space<vmem>>, vector<1x64x32xbf16>
    %172 = vector.shape_cast %171 : vector<1x64x32xbf16> to vector<64x32xbf16>
    %cst_82 = arith.constant dense<0.000000e+00> : vector<16x32xf32>
    %173 = tpu.matmul %170, %172, %cst_82 {dimension_numbers = #tpu.dot_dimension_numbers<[1], [0], [0], [1], [0, 0, 1, 1], [], []>} : vector<16x64xbf16>, vector<64x32xbf16>, vector<16x32xf32> -> vector<16x32xf32>
    %c0_83 = arith.constant 0 : index
    %c9 = arith.constant 9 : index
    %c0_84 = arith.constant 0 : index
    %174 = vector.load %arg6[%c0_83, %c9, %c0_84] : memref<2x16x64xf32, #tpu.memory_space<vmem>>, vector<1x1x32xf32>
    %175 = vector.shape_cast %174 : vector<1x1x32xf32> to vector<1x32xf32>
    %176 = vector.broadcast %175 : vector<1x32xf32> to vector<16x32xf32>
    %177 = arith.addf %173, %176 : vector<16x32xf32>
    %178 = arith.addf %159, %177 : vector<16x32xf32>
    %c0_85 = arith.constant 0 : index
    %c6 = arith.constant 6 : index
    %c0_86 = arith.constant 0 : index
    %179 = vector.load %arg6[%c0_85, %c6, %c0_86] : memref<2x16x64xf32, #tpu.memory_space<vmem>>, vector<1x1x32xf32>
    %180 = vector.shape_cast %179 : vector<1x1x32xf32> to vector<1x32xf32>
    %c0_87 = arith.constant 0 : index
    %c7 = arith.constant 7 : index
    %c0_88 = arith.constant 0 : index
    %181 = vector.load %arg6[%c0_87, %c7, %c0_88] : memref<2x16x64xf32, #tpu.memory_space<vmem>>, vector<1x1x32xf32>
    %182 = vector.shape_cast %181 : vector<1x1x32xf32> to vector<1x32xf32>
    %cst_89 = arith.constant dense<0.000000e+00> : vector<16xf32>
    %183 = vector.multi_reduction <add>, %178, %cst_89 [1] : vector<16x32xf32> to vector<16xf32>
    %184 = vector.shape_cast %183 : vector<16xf32> to vector<16x1xf32>
    %cst_90 = arith.constant 3.200000e+01 : f32
    %185 = vector.broadcast %cst_90 : f32 to vector<16x1xf32>
    %186 = arith.divf %184, %185 : vector<16x1xf32>
    %187 = vector.broadcast %186 : vector<16x1xf32> to vector<16x32xf32>
    %188 = arith.subf %178, %187 : vector<16x32xf32>
    %189 = arith.mulf %188, %188 : vector<16x32xf32>
    %cst_91 = arith.constant dense<0.000000e+00> : vector<16xf32>
    %190 = vector.multi_reduction <add>, %189, %cst_91 [1] : vector<16x32xf32> to vector<16xf32>
    %191 = vector.shape_cast %190 : vector<16xf32> to vector<16x1xf32>
    %cst_92 = arith.constant 3.200000e+01 : f32
    %192 = vector.broadcast %cst_92 : f32 to vector<16x1xf32>
    %193 = arith.divf %191, %192 : vector<16x1xf32>
    %194 = vector.broadcast %186 : vector<16x1xf32> to vector<16x32xf32>
    %195 = arith.subf %178, %194 : vector<16x32xf32>
    %cst_93 = arith.constant 9.99999974E-6 : f32
    %196 = vector.broadcast %cst_93 : f32 to vector<16x1xf32>
    %197 = arith.addf %193, %196 : vector<16x1xf32>
    %198 = math.rsqrt %197 : vector<16x1xf32>
    %199 = vector.broadcast %198 : vector<16x1xf32> to vector<16x32xf32>
    %200 = arith.mulf %195, %199 : vector<16x32xf32>
    %201 = vector.broadcast %180 : vector<1x32xf32> to vector<16x32xf32>
    %202 = arith.mulf %200, %201 : vector<16x32xf32>
    %203 = vector.broadcast %182 : vector<1x32xf32> to vector<16x32xf32>
    %204 = arith.addf %202, %203 : vector<16x32xf32>
    %205 = arith.truncf %204 : vector<16x32xf32> to vector<16x32xbf16>
    %c1_94 = arith.constant 1 : index
    %c0_95 = arith.constant 0 : index
    %c0_96 = arith.constant 0 : index
    %c0_97 = arith.constant 0 : index
    %206 = vector.load %arg2[%c1_94, %c0_95, %c0_96, %c0_97] : memref<2x3x32x32xbf16, #tpu.memory_space<vmem>>, vector<1x1x32x32xbf16>
    %207 = vector.shape_cast %206 : vector<1x1x32x32xbf16> to vector<32x32xbf16>
    %cst_98 = arith.constant dense<0.000000e+00> : vector<16x32xf32>
    %208 = tpu.matmul %205, %207, %cst_98 {dimension_numbers = #tpu.dot_dimension_numbers<[1], [0], [0], [1], [0, 0, 1, 1], [], []>} : vector<16x32xbf16>, vector<32x32xbf16>, vector<16x32xf32> -> vector<16x32xf32>
    %c1_99 = arith.constant 1 : index
    %c0_100 = arith.constant 0 : index
    %c0_101 = arith.constant 0 : index
    %209 = vector.load %arg6[%c1_99, %c0_100, %c0_101] : memref<2x16x64xf32, #tpu.memory_space<vmem>>, vector<1x1x32xf32>
    %210 = vector.shape_cast %209 : vector<1x1x32xf32> to vector<1x32xf32>
    %211 = vector.broadcast %210 : vector<1x32xf32> to vector<16x32xf32>
    %212 = arith.addf %208, %211 : vector<16x32xf32>
    %c1_102 = arith.constant 1 : index
    %c1_103 = arith.constant 1 : index
    %c0_104 = arith.constant 0 : index
    %c0_105 = arith.constant 0 : index
    %213 = vector.load %arg2[%c1_102, %c1_103, %c0_104, %c0_105] : memref<2x3x32x32xbf16, #tpu.memory_space<vmem>>, vector<1x1x32x32xbf16>
    %214 = vector.shape_cast %213 : vector<1x1x32x32xbf16> to vector<32x32xbf16>
    %cst_106 = arith.constant dense<0.000000e+00> : vector<16x32xf32>
    %215 = tpu.matmul %205, %214, %cst_106 {dimension_numbers = #tpu.dot_dimension_numbers<[1], [0], [0], [1], [0, 0, 1, 1], [], []>} : vector<16x32xbf16>, vector<32x32xbf16>, vector<16x32xf32> -> vector<16x32xf32>
    %c1_107 = arith.constant 1 : index
    %c1_108 = arith.constant 1 : index
    %c0_109 = arith.constant 0 : index
    %216 = vector.load %arg6[%c1_107, %c1_108, %c0_109] : memref<2x16x64xf32, #tpu.memory_space<vmem>>, vector<1x1x32xf32>
    %217 = vector.shape_cast %216 : vector<1x1x32xf32> to vector<1x32xf32>
    %218 = vector.broadcast %217 : vector<1x32xf32> to vector<16x32xf32>
    %219 = arith.addf %215, %218 : vector<16x32xf32>
    %c1_110 = arith.constant 1 : index
    %c2_111 = arith.constant 2 : index
    %c0_112 = arith.constant 0 : index
    %c0_113 = arith.constant 0 : index
    %220 = vector.load %arg2[%c1_110, %c2_111, %c0_112, %c0_113] : memref<2x3x32x32xbf16, #tpu.memory_space<vmem>>, vector<1x1x32x32xbf16>
    %221 = vector.shape_cast %220 : vector<1x1x32x32xbf16> to vector<32x32xbf16>
    %cst_114 = arith.constant dense<0.000000e+00> : vector<16x32xf32>
    %222 = tpu.matmul %205, %221, %cst_114 {dimension_numbers = #tpu.dot_dimension_numbers<[1], [0], [0], [1], [0, 0, 1, 1], [], []>} : vector<16x32xbf16>, vector<32x32xbf16>, vector<16x32xf32> -> vector<16x32xf32>
    %c1_115 = arith.constant 1 : index
    %c2_116 = arith.constant 2 : index
    %c0_117 = arith.constant 0 : index
    %223 = vector.load %arg6[%c1_115, %c2_116, %c0_117] : memref<2x16x64xf32, #tpu.memory_space<vmem>>, vector<1x1x32xf32>
    %224 = vector.shape_cast %223 : vector<1x1x32xf32> to vector<1x32xf32>
    %225 = vector.broadcast %224 : vector<1x32xf32> to vector<16x32xf32>
    %226 = arith.addf %222, %225 : vector<16x32xf32>
    %c1_118 = arith.constant 1 : index
    %c3_119 = arith.constant 3 : index
    %c0_120 = arith.constant 0 : index
    %227 = vector.load %arg6[%c1_118, %c3_119, %c0_120] : memref<2x16x64xf32, #tpu.memory_space<vmem>>, vector<1x1x32xf32>
    %228 = vector.shape_cast %227 : vector<1x1x32xf32> to vector<1x32xf32>
    %229 = vector.broadcast %228 : vector<1x32xf32> to vector<16x32xf32>
    %230 = arith.addf %204, %229 : vector<16x32xf32>
    %231 = vector.extract_strided_slice %212 {offsets = [0, 0], sizes = [16, 8], strides = [1, 1]} : vector<16x32xf32> to vector<16x8xf32>
    %232 = arith.truncf %231 : vector<16x8xf32> to vector<16x8xbf16>
    %233 = vector.extract_strided_slice %219 {offsets = [0, 0], sizes = [16, 8], strides = [1, 1]} : vector<16x32xf32> to vector<16x8xf32>
    %234 = arith.truncf %233 : vector<16x8xf32> to vector<16x8xbf16>
    %cst_121 = arith.constant dense<0.000000e+00> : vector<16x16xf32>
    %235 = tpu.matmul %232, %234, %cst_121 {dimension_numbers = #tpu.dot_dimension_numbers<[1], [1], [0], [0], [0, 0, 1, 0], [], []>} : vector<16x8xbf16>, vector<16x8xbf16>, vector<16x16xf32> -> vector<16x16xf32>
    %236 = arith.addf %235, %7 : vector<16x16xf32>
    %cst_122 = arith.constant dense<0xFF800000> : vector<16xf32>
    %237 = vector.multi_reduction <maximumf>, %236, %cst_122 [1] : vector<16x16xf32> to vector<16xf32>
    %238 = vector.shape_cast %237 : vector<16xf32> to vector<16x1xf32>
    %239 = vector.broadcast %238 : vector<16x1xf32> to vector<16x16xf32>
    %240 = arith.subf %236, %239 : vector<16x16xf32>
    %241 = math.exp %240 : vector<16x16xf32>
    %cst_123 = arith.constant dense<0.000000e+00> : vector<16xf32>
    %242 = vector.multi_reduction <add>, %241, %cst_123 [1] : vector<16x16xf32> to vector<16xf32>
    %243 = vector.shape_cast %242 : vector<16xf32> to vector<16x1xf32>
    %244 = tpu.reciprocal %243 {approx = true} : vector<16x1xf32> -> vector<16x1xf32>
    %245 = vector.broadcast %244 : vector<16x1xf32> to vector<16x16xf32>
    %246 = arith.mulf %241, %245 : vector<16x16xf32>
    %247 = arith.truncf %246 : vector<16x16xf32> to vector<16x16xbf16>
    %248 = vector.extract_strided_slice %226 {offsets = [0, 0], sizes = [16, 8], strides = [1, 1]} : vector<16x32xf32> to vector<16x8xf32>
    %249 = arith.truncf %248 : vector<16x8xf32> to vector<16x8xbf16>
    %cst_124 = arith.constant dense<0.000000e+00> : vector<16x8xf32>
    %250 = tpu.matmul %247, %249, %cst_124 {dimension_numbers = #tpu.dot_dimension_numbers<[1], [0], [0], [1], [0, 0, 1, 1], [], []>} : vector<16x16xbf16>, vector<16x8xbf16>, vector<16x8xf32> -> vector<16x8xf32>
    %251 = arith.truncf %250 : vector<16x8xf32> to vector<16x8xbf16>
    %c1_125 = arith.constant 1 : index
    %c0_126 = arith.constant 0 : index
    %c0_127 = arith.constant 0 : index
    %c0_128 = arith.constant 0 : index
    %252 = vector.load %arg3[%c1_125, %c0_126, %c0_127, %c0_128] : memref<2x4x8x32xbf16, #tpu.memory_space<vmem>>, vector<1x1x8x32xbf16>
    %253 = vector.shape_cast %252 : vector<1x1x8x32xbf16> to vector<8x32xbf16>
    %cst_129 = arith.constant dense<0.000000e+00> : vector<16x32xf32>
    %254 = tpu.matmul %251, %253, %cst_129 {dimension_numbers = #tpu.dot_dimension_numbers<[1], [0], [0], [1], [0, 0, 1, 1], [], []>} : vector<16x8xbf16>, vector<8x32xbf16>, vector<16x32xf32> -> vector<16x32xf32>
    %255 = arith.addf %230, %254 : vector<16x32xf32>
    %256 = vector.extract_strided_slice %212 {offsets = [0, 8], sizes = [16, 8], strides = [1, 1]} : vector<16x32xf32> to vector<16x8xf32>
    %257 = arith.truncf %256 : vector<16x8xf32> to vector<16x8xbf16>
    %258 = vector.extract_strided_slice %219 {offsets = [0, 8], sizes = [16, 8], strides = [1, 1]} : vector<16x32xf32> to vector<16x8xf32>
    %259 = arith.truncf %258 : vector<16x8xf32> to vector<16x8xbf16>
    %cst_130 = arith.constant dense<0.000000e+00> : vector<16x16xf32>
    %260 = tpu.matmul %257, %259, %cst_130 {dimension_numbers = #tpu.dot_dimension_numbers<[1], [1], [0], [0], [0, 0, 1, 0], [], []>} : vector<16x8xbf16>, vector<16x8xbf16>, vector<16x16xf32> -> vector<16x16xf32>
    %261 = arith.addf %260, %7 : vector<16x16xf32>
    %cst_131 = arith.constant dense<0xFF800000> : vector<16xf32>
    %262 = vector.multi_reduction <maximumf>, %261, %cst_131 [1] : vector<16x16xf32> to vector<16xf32>
    %263 = vector.shape_cast %262 : vector<16xf32> to vector<16x1xf32>
    %264 = vector.broadcast %263 : vector<16x1xf32> to vector<16x16xf32>
    %265 = arith.subf %261, %264 : vector<16x16xf32>
    %266 = math.exp %265 : vector<16x16xf32>
    %cst_132 = arith.constant dense<0.000000e+00> : vector<16xf32>
    %267 = vector.multi_reduction <add>, %266, %cst_132 [1] : vector<16x16xf32> to vector<16xf32>
    %268 = vector.shape_cast %267 : vector<16xf32> to vector<16x1xf32>
    %269 = tpu.reciprocal %268 {approx = true} : vector<16x1xf32> -> vector<16x1xf32>
    %270 = vector.broadcast %269 : vector<16x1xf32> to vector<16x16xf32>
    %271 = arith.mulf %266, %270 : vector<16x16xf32>
    %272 = arith.truncf %271 : vector<16x16xf32> to vector<16x16xbf16>
    %273 = vector.extract_strided_slice %226 {offsets = [0, 8], sizes = [16, 8], strides = [1, 1]} : vector<16x32xf32> to vector<16x8xf32>
    %274 = arith.truncf %273 : vector<16x8xf32> to vector<16x8xbf16>
    %cst_133 = arith.constant dense<0.000000e+00> : vector<16x8xf32>
    %275 = tpu.matmul %272, %274, %cst_133 {dimension_numbers = #tpu.dot_dimension_numbers<[1], [0], [0], [1], [0, 0, 1, 1], [], []>} : vector<16x16xbf16>, vector<16x8xbf16>, vector<16x8xf32> -> vector<16x8xf32>
    %276 = arith.truncf %275 : vector<16x8xf32> to vector<16x8xbf16>
    %c1_134 = arith.constant 1 : index
    %c1_135 = arith.constant 1 : index
    %c0_136 = arith.constant 0 : index
    %c0_137 = arith.constant 0 : index
    %277 = vector.load %arg3[%c1_134, %c1_135, %c0_136, %c0_137] : memref<2x4x8x32xbf16, #tpu.memory_space<vmem>>, vector<1x1x8x32xbf16>
    %278 = vector.shape_cast %277 : vector<1x1x8x32xbf16> to vector<8x32xbf16>
    %cst_138 = arith.constant dense<0.000000e+00> : vector<16x32xf32>
    %279 = tpu.matmul %276, %278, %cst_138 {dimension_numbers = #tpu.dot_dimension_numbers<[1], [0], [0], [1], [0, 0, 1, 1], [], []>} : vector<16x8xbf16>, vector<8x32xbf16>, vector<16x32xf32> -> vector<16x32xf32>
    %280 = arith.addf %255, %279 : vector<16x32xf32>
    %281 = vector.extract_strided_slice %212 {offsets = [0, 16], sizes = [16, 8], strides = [1, 1]} : vector<16x32xf32> to vector<16x8xf32>
    %282 = arith.truncf %281 : vector<16x8xf32> to vector<16x8xbf16>
    %283 = vector.extract_strided_slice %219 {offsets = [0, 16], sizes = [16, 8], strides = [1, 1]} : vector<16x32xf32> to vector<16x8xf32>
    %284 = arith.truncf %283 : vector<16x8xf32> to vector<16x8xbf16>
    %cst_139 = arith.constant dense<0.000000e+00> : vector<16x16xf32>
    %285 = tpu.matmul %282, %284, %cst_139 {dimension_numbers = #tpu.dot_dimension_numbers<[1], [1], [0], [0], [0, 0, 1, 0], [], []>} : vector<16x8xbf16>, vector<16x8xbf16>, vector<16x16xf32> -> vector<16x16xf32>
    %286 = arith.addf %285, %7 : vector<16x16xf32>
    %cst_140 = arith.constant dense<0xFF800000> : vector<16xf32>
    %287 = vector.multi_reduction <maximumf>, %286, %cst_140 [1] : vector<16x16xf32> to vector<16xf32>
    %288 = vector.shape_cast %287 : vector<16xf32> to vector<16x1xf32>
    %289 = vector.broadcast %288 : vector<16x1xf32> to vector<16x16xf32>
    %290 = arith.subf %286, %289 : vector<16x16xf32>
    %291 = math.exp %290 : vector<16x16xf32>
    %cst_141 = arith.constant dense<0.000000e+00> : vector<16xf32>
    %292 = vector.multi_reduction <add>, %291, %cst_141 [1] : vector<16x16xf32> to vector<16xf32>
    %293 = vector.shape_cast %292 : vector<16xf32> to vector<16x1xf32>
    %294 = tpu.reciprocal %293 {approx = true} : vector<16x1xf32> -> vector<16x1xf32>
    %295 = vector.broadcast %294 : vector<16x1xf32> to vector<16x16xf32>
    %296 = arith.mulf %291, %295 : vector<16x16xf32>
    %297 = arith.truncf %296 : vector<16x16xf32> to vector<16x16xbf16>
    %298 = vector.extract_strided_slice %226 {offsets = [0, 16], sizes = [16, 8], strides = [1, 1]} : vector<16x32xf32> to vector<16x8xf32>
    %299 = arith.truncf %298 : vector<16x8xf32> to vector<16x8xbf16>
    %cst_142 = arith.constant dense<0.000000e+00> : vector<16x8xf32>
    %300 = tpu.matmul %297, %299, %cst_142 {dimension_numbers = #tpu.dot_dimension_numbers<[1], [0], [0], [1], [0, 0, 1, 1], [], []>} : vector<16x16xbf16>, vector<16x8xbf16>, vector<16x8xf32> -> vector<16x8xf32>
    %301 = arith.truncf %300 : vector<16x8xf32> to vector<16x8xbf16>
    %c1_143 = arith.constant 1 : index
    %c2_144 = arith.constant 2 : index
    %c0_145 = arith.constant 0 : index
    %c0_146 = arith.constant 0 : index
    %302 = vector.load %arg3[%c1_143, %c2_144, %c0_145, %c0_146] : memref<2x4x8x32xbf16, #tpu.memory_space<vmem>>, vector<1x1x8x32xbf16>
    %303 = vector.shape_cast %302 : vector<1x1x8x32xbf16> to vector<8x32xbf16>
    %cst_147 = arith.constant dense<0.000000e+00> : vector<16x32xf32>
    %304 = tpu.matmul %301, %303, %cst_147 {dimension_numbers = #tpu.dot_dimension_numbers<[1], [0], [0], [1], [0, 0, 1, 1], [], []>} : vector<16x8xbf16>, vector<8x32xbf16>, vector<16x32xf32> -> vector<16x32xf32>
    %305 = arith.addf %280, %304 : vector<16x32xf32>
    %306 = vector.extract_strided_slice %212 {offsets = [0, 24], sizes = [16, 8], strides = [1, 1]} : vector<16x32xf32> to vector<16x8xf32>
    %307 = arith.truncf %306 : vector<16x8xf32> to vector<16x8xbf16>
    %308 = vector.extract_strided_slice %219 {offsets = [0, 24], sizes = [16, 8], strides = [1, 1]} : vector<16x32xf32> to vector<16x8xf32>
    %309 = arith.truncf %308 : vector<16x8xf32> to vector<16x8xbf16>
    %cst_148 = arith.constant dense<0.000000e+00> : vector<16x16xf32>
    %310 = tpu.matmul %307, %309, %cst_148 {dimension_numbers = #tpu.dot_dimension_numbers<[1], [1], [0], [0], [0, 0, 1, 0], [], []>} : vector<16x8xbf16>, vector<16x8xbf16>, vector<16x16xf32> -> vector<16x16xf32>
    %311 = arith.addf %310, %7 : vector<16x16xf32>
    %cst_149 = arith.constant dense<0xFF800000> : vector<16xf32>
    %312 = vector.multi_reduction <maximumf>, %311, %cst_149 [1] : vector<16x16xf32> to vector<16xf32>
    %313 = vector.shape_cast %312 : vector<16xf32> to vector<16x1xf32>
    %314 = vector.broadcast %313 : vector<16x1xf32> to vector<16x16xf32>
    %315 = arith.subf %311, %314 : vector<16x16xf32>
    %316 = math.exp %315 : vector<16x16xf32>
    %cst_150 = arith.constant dense<0.000000e+00> : vector<16xf32>
    %317 = vector.multi_reduction <add>, %316, %cst_150 [1] : vector<16x16xf32> to vector<16xf32>
    %318 = vector.shape_cast %317 : vector<16xf32> to vector<16x1xf32>
    %319 = tpu.reciprocal %318 {approx = true} : vector<16x1xf32> -> vector<16x1xf32>
    %320 = vector.broadcast %319 : vector<16x1xf32> to vector<16x16xf32>
    %321 = arith.mulf %316, %320 : vector<16x16xf32>
    %322 = arith.truncf %321 : vector<16x16xf32> to vector<16x16xbf16>
    %323 = vector.extract_strided_slice %226 {offsets = [0, 24], sizes = [16, 8], strides = [1, 1]} : vector<16x32xf32> to vector<16x8xf32>
    %324 = arith.truncf %323 : vector<16x8xf32> to vector<16x8xbf16>
    %cst_151 = arith.constant dense<0.000000e+00> : vector<16x8xf32>
    %325 = tpu.matmul %322, %324, %cst_151 {dimension_numbers = #tpu.dot_dimension_numbers<[1], [0], [0], [1], [0, 0, 1, 1], [], []>} : vector<16x16xbf16>, vector<16x8xbf16>, vector<16x8xf32> -> vector<16x8xf32>
    %326 = arith.truncf %325 : vector<16x8xf32> to vector<16x8xbf16>
    %c1_152 = arith.constant 1 : index
    %c3_153 = arith.constant 3 : index
    %c0_154 = arith.constant 0 : index
    %c0_155 = arith.constant 0 : index
    %327 = vector.load %arg3[%c1_152, %c3_153, %c0_154, %c0_155] : memref<2x4x8x32xbf16, #tpu.memory_space<vmem>>, vector<1x1x8x32xbf16>
    %328 = vector.shape_cast %327 : vector<1x1x8x32xbf16> to vector<8x32xbf16>
    %cst_156 = arith.constant dense<0.000000e+00> : vector<16x32xf32>
    %329 = tpu.matmul %326, %328, %cst_156 {dimension_numbers = #tpu.dot_dimension_numbers<[1], [0], [0], [1], [0, 0, 1, 1], [], []>} : vector<16x8xbf16>, vector<8x32xbf16>, vector<16x32xf32> -> vector<16x32xf32>
    %330 = arith.addf %305, %329 : vector<16x32xf32>
    %c1_157 = arith.constant 1 : index
    %c4_158 = arith.constant 4 : index
    %c0_159 = arith.constant 0 : index
    %331 = vector.load %arg6[%c1_157, %c4_158, %c0_159] : memref<2x16x64xf32, #tpu.memory_space<vmem>>, vector<1x1x32xf32>
    %332 = vector.shape_cast %331 : vector<1x1x32xf32> to vector<1x32xf32>
    %c1_160 = arith.constant 1 : index
    %c5_161 = arith.constant 5 : index
    %c0_162 = arith.constant 0 : index
    %333 = vector.load %arg6[%c1_160, %c5_161, %c0_162] : memref<2x16x64xf32, #tpu.memory_space<vmem>>, vector<1x1x32xf32>
    %334 = vector.shape_cast %333 : vector<1x1x32xf32> to vector<1x32xf32>
    %cst_163 = arith.constant dense<0.000000e+00> : vector<16xf32>
    %335 = vector.multi_reduction <add>, %330, %cst_163 [1] : vector<16x32xf32> to vector<16xf32>
    %336 = vector.shape_cast %335 : vector<16xf32> to vector<16x1xf32>
    %cst_164 = arith.constant 3.200000e+01 : f32
    %337 = vector.broadcast %cst_164 : f32 to vector<16x1xf32>
    %338 = arith.divf %336, %337 : vector<16x1xf32>
    %339 = vector.broadcast %338 : vector<16x1xf32> to vector<16x32xf32>
    %340 = arith.subf %330, %339 : vector<16x32xf32>
    %341 = arith.mulf %340, %340 : vector<16x32xf32>
    %cst_165 = arith.constant dense<0.000000e+00> : vector<16xf32>
    %342 = vector.multi_reduction <add>, %341, %cst_165 [1] : vector<16x32xf32> to vector<16xf32>
    %343 = vector.shape_cast %342 : vector<16xf32> to vector<16x1xf32>
    %cst_166 = arith.constant 3.200000e+01 : f32
    %344 = vector.broadcast %cst_166 : f32 to vector<16x1xf32>
    %345 = arith.divf %343, %344 : vector<16x1xf32>
    %346 = vector.broadcast %338 : vector<16x1xf32> to vector<16x32xf32>
    %347 = arith.subf %330, %346 : vector<16x32xf32>
    %cst_167 = arith.constant 9.99999974E-6 : f32
    %348 = vector.broadcast %cst_167 : f32 to vector<16x1xf32>
    %349 = arith.addf %345, %348 : vector<16x1xf32>
    %350 = math.rsqrt %349 : vector<16x1xf32>
    %351 = vector.broadcast %350 : vector<16x1xf32> to vector<16x32xf32>
    %352 = arith.mulf %347, %351 : vector<16x32xf32>
    %353 = vector.broadcast %332 : vector<1x32xf32> to vector<16x32xf32>
    %354 = arith.mulf %352, %353 : vector<16x32xf32>
    %355 = vector.broadcast %334 : vector<1x32xf32> to vector<16x32xf32>
    %356 = arith.addf %354, %355 : vector<16x32xf32>
    %357 = arith.truncf %356 : vector<16x32xf32> to vector<16x32xbf16>
    %c1_168 = arith.constant 1 : index
    %c0_169 = arith.constant 0 : index
    %c0_170 = arith.constant 0 : index
    %358 = vector.load %arg4[%c1_168, %c0_169, %c0_170] : memref<2x32x64xbf16, #tpu.memory_space<vmem>>, vector<1x32x64xbf16>
    %359 = vector.shape_cast %358 : vector<1x32x64xbf16> to vector<32x64xbf16>
    %cst_171 = arith.constant dense<0.000000e+00> : vector<16x64xf32>
    %360 = tpu.matmul %357, %359, %cst_171 {dimension_numbers = #tpu.dot_dimension_numbers<[1], [0], [0], [1], [0, 0, 1, 1], [], []>} : vector<16x32xbf16>, vector<32x64xbf16>, vector<16x64xf32> -> vector<16x64xf32>
    %c1_172 = arith.constant 1 : index
    %c8_173 = arith.constant 8 : index
    %c0_174 = arith.constant 0 : index
    %361 = vector.load %arg6[%c1_172, %c8_173, %c0_174] : memref<2x16x64xf32, #tpu.memory_space<vmem>>, vector<1x1x64xf32>
    %362 = vector.shape_cast %361 : vector<1x1x64xf32> to vector<1x64xf32>
    %363 = vector.broadcast %362 : vector<1x64xf32> to vector<16x64xf32>
    %364 = arith.addf %360, %363 : vector<16x64xf32>
    %cst_175 = arith.constant 0.000000e+00 : f32
    %365 = vector.broadcast %cst_175 : f32 to vector<16x64xf32>
    %366 = arith.maximumf %364, %365 : vector<16x64xf32>
    %367 = arith.truncf %366 : vector<16x64xf32> to vector<16x64xbf16>
    %c1_176 = arith.constant 1 : index
    %c0_177 = arith.constant 0 : index
    %c0_178 = arith.constant 0 : index
    %368 = vector.load %arg5[%c1_176, %c0_177, %c0_178] : memref<2x64x32xbf16, #tpu.memory_space<vmem>>, vector<1x64x32xbf16>
    %369 = vector.shape_cast %368 : vector<1x64x32xbf16> to vector<64x32xbf16>
    %cst_179 = arith.constant dense<0.000000e+00> : vector<16x32xf32>
    %370 = tpu.matmul %367, %369, %cst_179 {dimension_numbers = #tpu.dot_dimension_numbers<[1], [0], [0], [1], [0, 0, 1, 1], [], []>} : vector<16x64xbf16>, vector<64x32xbf16>, vector<16x32xf32> -> vector<16x32xf32>
    %c1_180 = arith.constant 1 : index
    %c9_181 = arith.constant 9 : index
    %c0_182 = arith.constant 0 : index
    %371 = vector.load %arg6[%c1_180, %c9_181, %c0_182] : memref<2x16x64xf32, #tpu.memory_space<vmem>>, vector<1x1x32xf32>
    %372 = vector.shape_cast %371 : vector<1x1x32xf32> to vector<1x32xf32>
    %373 = vector.broadcast %372 : vector<1x32xf32> to vector<16x32xf32>
    %374 = arith.addf %370, %373 : vector<16x32xf32>
    %375 = arith.addf %356, %374 : vector<16x32xf32>
    %c1_183 = arith.constant 1 : index
    %c6_184 = arith.constant 6 : index
    %c0_185 = arith.constant 0 : index
    %376 = vector.load %arg6[%c1_183, %c6_184, %c0_185] : memref<2x16x64xf32, #tpu.memory_space<vmem>>, vector<1x1x32xf32>
    %377 = vector.shape_cast %376 : vector<1x1x32xf32> to vector<1x32xf32>
    %c1_186 = arith.constant 1 : index
    %c7_187 = arith.constant 7 : index
    %c0_188 = arith.constant 0 : index
    %378 = vector.load %arg6[%c1_186, %c7_187, %c0_188] : memref<2x16x64xf32, #tpu.memory_space<vmem>>, vector<1x1x32xf32>
    %379 = vector.shape_cast %378 : vector<1x1x32xf32> to vector<1x32xf32>
    %cst_189 = arith.constant dense<0.000000e+00> : vector<16xf32>
    %380 = vector.multi_reduction <add>, %375, %cst_189 [1] : vector<16x32xf32> to vector<16xf32>
    %381 = vector.shape_cast %380 : vector<16xf32> to vector<16x1xf32>
    %cst_190 = arith.constant 3.200000e+01 : f32
    %382 = vector.broadcast %cst_190 : f32 to vector<16x1xf32>
    %383 = arith.divf %381, %382 : vector<16x1xf32>
    %384 = vector.broadcast %383 : vector<16x1xf32> to vector<16x32xf32>
    %385 = arith.subf %375, %384 : vector<16x32xf32>
    %386 = arith.mulf %385, %385 : vector<16x32xf32>
    %cst_191 = arith.constant dense<0.000000e+00> : vector<16xf32>
    %387 = vector.multi_reduction <add>, %386, %cst_191 [1] : vector<16x32xf32> to vector<16xf32>
    %388 = vector.shape_cast %387 : vector<16xf32> to vector<16x1xf32>
    %cst_192 = arith.constant 3.200000e+01 : f32
    %389 = vector.broadcast %cst_192 : f32 to vector<16x1xf32>
    %390 = arith.divf %388, %389 : vector<16x1xf32>
    %391 = vector.broadcast %383 : vector<16x1xf32> to vector<16x32xf32>
    %392 = arith.subf %375, %391 : vector<16x32xf32>
    %cst_193 = arith.constant 9.99999974E-6 : f32
    %393 = vector.broadcast %cst_193 : f32 to vector<16x1xf32>
    %394 = arith.addf %390, %393 : vector<16x1xf32>
    %395 = math.rsqrt %394 : vector<16x1xf32>
    %396 = vector.broadcast %395 : vector<16x1xf32> to vector<16x32xf32>
    %397 = arith.mulf %392, %396 : vector<16x32xf32>
    %398 = vector.broadcast %377 : vector<1x32xf32> to vector<16x32xf32>
    %399 = arith.mulf %397, %398 : vector<16x32xf32>
    %400 = vector.broadcast %379 : vector<1x32xf32> to vector<16x32xf32>
    %401 = arith.addf %399, %400 : vector<16x32xf32>
    %402 = vector.extract_strided_slice %401 {offsets = [8, 0], sizes = [1, 32], strides = [1, 1]} : vector<16x32xf32> to vector<1x32xf32>
    %c0_194 = arith.constant 0 : index
    %c0_195 = arith.constant 0 : index
    %403 = vector.load %arg7[%c0_194, %c0_195] : memref<8x128xf32, #tpu.memory_space<vmem>>, vector<1x32xf32>
    %c1_196 = arith.constant 1 : index
    %c0_197 = arith.constant 0 : index
    %404 = vector.load %arg7[%c1_196, %c0_197] : memref<8x128xf32, #tpu.memory_space<vmem>>, vector<1x32xf32>
    %cst_198 = arith.constant dense<0.000000e+00> : vector<1xf32>
    %405 = vector.multi_reduction <add>, %402, %cst_198 [1] : vector<1x32xf32> to vector<1xf32>
    %406 = vector.shape_cast %405 : vector<1xf32> to vector<1x1xf32>
    %cst_199 = arith.constant 3.200000e+01 : f32
    %407 = vector.broadcast %cst_199 : f32 to vector<1x1xf32>
    %408 = arith.divf %406, %407 : vector<1x1xf32>
    %409 = vector.broadcast %408 : vector<1x1xf32> to vector<1x32xf32>
    %410 = arith.subf %402, %409 : vector<1x32xf32>
    %411 = arith.mulf %410, %410 : vector<1x32xf32>
    %cst_200 = arith.constant dense<0.000000e+00> : vector<1xf32>
    %412 = vector.multi_reduction <add>, %411, %cst_200 [1] : vector<1x32xf32> to vector<1xf32>
    %413 = vector.shape_cast %412 : vector<1xf32> to vector<1x1xf32>
    %cst_201 = arith.constant 3.200000e+01 : f32
    %414 = vector.broadcast %cst_201 : f32 to vector<1x1xf32>
    %415 = arith.divf %413, %414 : vector<1x1xf32>
    %416 = vector.broadcast %408 : vector<1x1xf32> to vector<1x32xf32>
    %417 = arith.subf %402, %416 : vector<1x32xf32>
    %cst_202 = arith.constant 9.99999974E-6 : f32
    %418 = vector.broadcast %cst_202 : f32 to vector<1x1xf32>
    %419 = arith.addf %415, %418 : vector<1x1xf32>
    %420 = math.rsqrt %419 : vector<1x1xf32>
    %421 = vector.broadcast %420 : vector<1x1xf32> to vector<1x32xf32>
    %422 = arith.mulf %417, %421 : vector<1x32xf32>
    %423 = arith.mulf %422, %403 : vector<1x32xf32>
    %424 = arith.addf %423, %404 : vector<1x32xf32>
    %425 = arith.truncf %424 : vector<1x32xf32> to vector<1x32xbf16>
    %c0_203 = arith.constant 0 : index
    %c0_204 = arith.constant 0 : index
    %426 = vector.load %arg8[%c0_203, %c0_204] : memref<32x128xbf16, #tpu.memory_space<vmem>>, vector<32x128xbf16>
    %cst_205 = arith.constant dense<0.000000e+00> : vector<1x128xf32>
    %427 = tpu.matmul %425, %426, %cst_205 {dimension_numbers = #tpu.dot_dimension_numbers<[1], [0], [0], [1], [0, 0, 1, 1], [], []>} : vector<1x32xbf16>, vector<32x128xbf16>, vector<1x128xf32> -> vector<1x128xf32>
    %c2_206 = arith.constant 2 : index
    %c0_207 = arith.constant 0 : index
    %428 = vector.load %arg7[%c2_206, %c0_207] : memref<8x128xf32, #tpu.memory_space<vmem>>, vector<1x128xf32>
    %429 = arith.addf %427, %428 : vector<1x128xf32>
    %430 = vector.shape_cast %429 : vector<1x128xf32> to vector<1x128xf32>
    %431 = vector.broadcast %430 : vector<1x128xf32> to vector<8x128xf32>
    %c0_208 = arith.constant 0 : index
    %c0_209 = arith.constant 0 : index
    %c0_210 = arith.constant 0 : index
    %432 = vector.load %arg9[%c0_208, %c0_209, %c0_210] : memref<1x8x128xf32, #tpu.memory_space<vmem>>, vector<1x8x128xf32>
    %433 = vector.shape_cast %432 : vector<1x8x128xf32> to vector<8x128xf32>
    %434 = vector.shape_cast %431 : vector<8x128xf32> to vector<1x8x128xf32>
    tpu.vector_store %arg9[%c0_208, %c0_209, %c0_210], %434 {strides = array<i32>} : memref<1x8x128xf32, #tpu.memory_space<vmem>>, vector<1x8x128xf32>,
    return
  }
  func.func @transform_0(%arg0: i32) -> (i32, i32, i32) {
    %c0_i32 = arith.constant 0 : i32
    %c0_i32_0 = arith.constant 0 : i32
    %c0_i32_1 = arith.constant 0 : i32
    return %arg0, %c0_i32, %c0_i32_0 : i32, i32, i32
  }
  func.func @transform_1(%arg0: i32) -> (i32, i32, i32, i32) {
    %c0_i32 = arith.constant 0 : i32
    %c0_i32_0 = arith.constant 0 : i32
    %c0_i32_1 = arith.constant 0 : i32
    %c0_i32_2 = arith.constant 0 : i32
    %c0_i32_3 = arith.constant 0 : i32
    return %c0_i32, %c0_i32_0, %c0_i32_1, %c0_i32_2 : i32, i32, i32, i32
  }
  func.func @transform_2(%arg0: i32) -> (i32, i32, i32, i32) {
    %c0_i32 = arith.constant 0 : i32
    %c0_i32_0 = arith.constant 0 : i32
    %c0_i32_1 = arith.constant 0 : i32
    %c0_i32_2 = arith.constant 0 : i32
    %c0_i32_3 = arith.constant 0 : i32
    return %c0_i32, %c0_i32_0, %c0_i32_1, %c0_i32_2 : i32, i32, i32, i32
  }
  func.func @transform_3(%arg0: i32) -> (i32, i32, i32) {
    %c0_i32 = arith.constant 0 : i32
    %c0_i32_0 = arith.constant 0 : i32
    %c0_i32_1 = arith.constant 0 : i32
    %c0_i32_2 = arith.constant 0 : i32
    return %c0_i32, %c0_i32_0, %c0_i32_1 : i32, i32, i32
  }
  func.func @transform_4(%arg0: i32) -> (i32, i32, i32) {
    %c0_i32 = arith.constant 0 : i32
    %c0_i32_0 = arith.constant 0 : i32
    %c0_i32_1 = arith.constant 0 : i32
    %c0_i32_2 = arith.constant 0 : i32
    return %c0_i32, %c0_i32_0, %c0_i32_1 : i32, i32, i32
  }
  func.func @transform_5(%arg0: i32) -> (i32, i32, i32) {
    %c0_i32 = arith.constant 0 : i32
    %c0_i32_0 = arith.constant 0 : i32
    %c0_i32_1 = arith.constant 0 : i32
    %c0_i32_2 = arith.constant 0 : i32
    return %c0_i32, %c0_i32_0, %c0_i32_1 : i32, i32, i32
  }
  func.func @transform_6(%arg0: i32) -> (i32, i32) {
    %c0_i32 = arith.constant 0 : i32
    %c0_i32_0 = arith.constant 0 : i32
    %c0_i32_1 = arith.constant 0 : i32
    return %c0_i32, %c0_i32_0 : i32, i32
  }
  func.func @transform_7(%arg0: i32) -> (i32, i32) {
    %c0_i32 = arith.constant 0 : i32
    %c0_i32_0 = arith.constant 0 : i32
    %c0_i32_1 = arith.constant 0 : i32
    return %c0_i32, %c0_i32_0 : i32, i32
  }
  func.func @transform_8(%arg0: i32) -> (i32, i32, i32) {
    %c0_i32 = arith.constant 0 : i32
    %c0_i32_0 = arith.constant 0 : i32
    %c0_i32_1 = arith.constant 0 : i32
    return %arg0, %c0_i32, %c0_i32_0 : i32, i32, i32
  }
}

</mosaic_0001>

<bundles_post_ra>
// kernel: transformer_forward.1
= control target key start
LH: loop header
LB: loop body
LE: loop exit
PB: predicated region body
PF: predicated region fallthrough
CT: control target
= control target key end

     0   :  { %s3334_s27 = smov 0   ;;  %s3856_s0 = inlined_call_operand.vmem [shape: f32[2,16,32], index: 0, kind: input, shape index: {}]   ;;  %s3857_s1 = inlined_call_operand.vmem [shape: bf16[2,3,32,32], index: 1, kind: input, shape index: {}]   ;;  %s3858_s2 = inlined_call_operand.vmem [shape: bf16[2,4,8,32], index: 2, kind: input, shape index: {}]   ;;  %s3859_s3 = inlined_call_operand.vmem [shape: bf16[2,32,64], index: 3, kind: input, shape index: {}]   ;;  %s3860_s4 = inlined_call_operand.vmem [shape: bf16[2,64,32], index: 4, kind: input, shape index: {}]   ;;  %s3861_s5 = inlined_call_operand.vmem [shape: f32[2,16,64], index: 5, kind: input, shape index: {}]   ;;  %s3862_s6 = inlined_call_operand.vmem [shape: f32[8,128], index: 6, kind: input, shape index: {}]   ;;  %s3863_s7 = inlined_call_operand.vmem [shape: bf16[32,128], index: 7, kind: input, shape index: {}]   ;;  %s3864_s8 = inlined_call_operand.vmem [shape: f32[2,8,128], index: 8, kind: output, shape index: {}]  }
   0x1 LB: > { %s2689_s28 = sadd.s32 4294967295, %s3281_s27   ;;  %p2693_p0 = scmp.ge.s32.totalorder %s3281_s27, 1  ;;  %s3281_s27 = sphi %s3334_s27, %s18_s27  }
   0x2   : > { %p262_p1 = scmp.lt.s32.totalorder %s3281_s27, 3 }
   0x4   : > { %p263_p2 = pnand %p2693_p0, %p262_p1 }
   0x5   : > { %p295_p3 = scmp.lt.s32.totalorder (!%p263_p2), %s2689_s28, 1  ;;  %s3286_s29 = smov (!%p263_p2), 120  }
   0x6   : > { %266 = sbr.rel (%p263_p2) target bundleno = 7949 (0x1f0d), region = 52  ;;  %s3287_s12 = smov (!%p263_p2), 112  }
   0xb   : > { %v3169_v0 = vld [vmem:[%s3857_s1 + $0x18] sm:$0xff]   ;;  %v3283_v1 = vmov 0.0   ;;  %v3170_v2 = vld [vmem:[%s3857_s1 + $0x8] sm:$0xff]   ;;  %v3171_v3 = vld [vmem:[%s3857_s1 + $0x10] sm:$0xff]   ;;  %vm3284_vm0 = vmmov 0   ;;  %s3866_s28 = smov (!%p295_p3, %s2689_s28), 1  ;;  %v307_v27 = vlaneseq }
   0xc   : > { %2923 = vmatprep.subr.bf16.mxu1 %v3283_v1  ;;  %2915 = vmatprep.subr.bf16.mxu0 %v3283_v1  ;;  %v3172_v4 = vld [vmem:[%s3857_s1] sm:$0xff]   ;;  %s2829_s15 = sshll.u32 %s3866_s28, 4  ;;  %vm338_vm1 = vcmask 261120   ;;  %vm518_vm2 = vcmask 64512   ;;  %v3173_v25 = vld [vmem:[%s3857_s1 + $0x28] sm:$0xff]   ;;  %vm566_vm5 = vcmask 130048  }
   0xd   : > { %2924 = vmatpush3.bf16.msra.mxu1 %v3169_v0  ;;  %2927 = vmatprep.mubr.msk.bf16.mxu1 %vm3284_vm0, %v3283_v1  ;;  %s299_s18 = scalar_lea.vmem %s3856_s0, %s2829_s15  ;;  %v2705_v10 = vld [vmem:[%s3861_s5 + $0x1] ss:$0 sm:$0xff]  ;;  %v2697_v20 = vld [vmem:[%s3861_s5] ss:$0 sm:$0xff]  ;;  %v3410_v28 = vshrl.u32 %v307_v27, 7  ;;  %v311_v29 = vand.u32 127, %v307_v27 }
   0xe   : > { %2916 = vmatpush3.bf16.msra.mxu0 %v3170_v2  ;;  %2925 = vmatprep.subr.bf16.mxu1 %v3283_v1  ;;  %v3369_v5 = vld [vmem:[%s299_s18] sm:$0xff]  ;;  %v3371_v6 = vld [vmem:[%s299_s18 + $0x8] sm:$0xff]  ;;  %v3285_v31 = vmov -1e+30   ;;  %vm640_vm6 = vcmask 1043456   ;;  %s3288_s15 = smov 104  }
   0xf   : > { %2917 = vmatprep.subr.bf16.mxu0 %v3283_v1  ;;  %2919 = vmatprep.mubr.msk.bf16.mxu0 %vm3284_vm0, %v3283_v1  ;;  %v316_v7 = vpack.c.bf16 %v3371_v6, %v3369_v5  ;;  %v3174_v26 = vld [vmem:[%s3857_s1 + $0x20] sm:$0xff]   ;;  %vm312_vm3 = vcmp.le.s32.totalorder %v311_v29, %v3410_v28  ;;  %v309_v30 = vadd.s32 8, %v3410_v28  ;;  %vm1356_vm7 = vcmask 523264  }
  0x10   : > { %v3414_v32 = vsel %vm312_vm3, 0.0, %v3285_v31  ;;  %v2713_v52 = vld [vmem:[%s3861_s5 + $0x2] ss:$0 sm:$0xff]  ;;  %vm2554_vm8 = vcmask 253952  }
  0x11   : > { %2926 = vmatpush3.bf16.msra.mxu1 %v3171_v3  ;;  %vm313_vm4 = vcmp.le.s32.totalorder %v311_v29, %v309_v30 }
  0x12   : > { %2918 = vmatpush3.bf16.msra.mxu0 %v3172_v4  ;;  %2939 = vmatprep.subr.bf16.mxu1 %v3283_v1  ;;  %v3417_v36 = vsel %vm313_vm4, 0.0, %v3285_v31 }
  0x13   : > { %2931 = vmatprep.subr.bf16.mxu0 %v3283_v1 }
  0x14   : > { %2928 = vmatmul.mubr.msk.bf16.vlgmr.msra.gmra.mxu1 %vm338_vm1, %v316_v7 }
  0x15   : > { %2920 = vmatmul.mubr.msk.bf16.vlgmr.msra.gmra.mxu0 %vm338_vm1, %v316_v7  ;;  %2941 = vmatprep.mubr.msk.bf16.mxu1 %vm3284_vm0, %v3283_v1 }
  0x16   : > { %2935 = vmatprep.mubr.msk.bf16.mxu0 %vm3284_vm0, %v3283_v1  ;;  %2932 = vmatpush3.bf16.msra.mxu0 %v3173_v25 }
  0x17   : > { %2933 = vmatprep.subr.bf16.mxu0 %v3283_v1 }
  0x1a   : > { %2934 = vmatpush3.bf16.msra.mxu0 %v3174_v26 }
  0x1b   : > { %2945 = vmatprep.subr.bf16.mxu0 %v3283_v1 }
  0x1d   : > { %2936 = vmatmul.mubr.msk.bf16.vlgmr.msra.gmra.mxu0 %vm338_vm1, %v316_v7 }
  0x1e   : > { %2947 = vmatprep.mubr.msk.bf16.mxu0 %vm3284_vm0, %v3283_v1 }
  0xd4   : > { %v439_v8 = vpop.f32.mrf.mxu1 }
  0xd5   : > { %v376_v9 = vpop.f32.mrf.mxu0  ;;  %v440_v15 = vadd.f32 %v2705_v10, %v439_v8 }
  0xd6   : > { %v2929_v11 = vpop.f32.mrf.mxu1  ;;  %v377_v22 = vadd.f32 %v2697_v20, %v376_v9  ;;  %v636_v9 = vld [vmem:[%s3858_s2] sm:$0xf] }
  0xd7   : > { %v2921_v12 = vpop.f32.mrf.mxu0 }
  0xd8   : > { %v442_v13 = vpop.f32.mrf.mxu1 }
  0xd9   : > { %v379_v14 = vpop.f32.mrf.mxu0  ;;  %v443_v16 = vadd.f32 %v2705_v10, %v442_v13  ;;  %v642_v10 = vsel %vm640_vm6, %v636_v9, 0 }
  0xda   : > { %v2930_v17 = vpop.f32.mrf.mxu1  ;;  %v380_v23 = vadd.f32 %v2697_v20, %v379_v14 }
  0xdb   : > { %v2922_v18 = vpop.f32.mrf.mxu0  ;;  %v3385_v19 = vpack.c.bf16 %v443_v16, %v440_v15 }
  0xdc   : > { %v3393_v24 = vpack.c.bf16 %v380_v23, %v377_v22 }
  0xdd   : > { %v523_v21 = vsel %vm518_vm2, %v3385_v19, 0  ;;  %v502_v53 = vpop.f32.mrf.mxu0 }
  0xde   : > { %2940 = vmatpush3.bf16.xpose.msra.mxu1 %v523_v21  ;;  %v503_v55 = vadd.f32 %v2713_v52, %v502_v53 }
  0xdf   : > { %2951 = vmatprep.subr.bf16.mxu1 %v3283_v1  ;;  %v2937_v54 = vpop.f32.mrf.mxu0 }
  0xe0   : > { %v2723_v54 = vld [vmem:[%s3858_s2 + $0x4] sm:$0xf] }
  0xe1   : > { %v505_v56 = vpop.f32.mrf.mxu0 }
  0xe2   : > { %v506_v57 = vadd.f32 %v2713_v52, %v505_v56 }
  0xe3   : > { %v2938_v58 = vpop.f32.mrf.mxu0 }
  0xe4   : > { %v3429_v59 = vpack.c.bf16 %v506_v57, %v503_v55  ;;  %v818_v55 = vsel %vm640_vm6, %v2723_v54, 0 }
  0xe5   : > { %2942 = vmatmul.mubr.msk.bf16.vlgmr.msra.gmra.mxu1 %vm518_vm2, %v3393_v24 }
  0xe6   : > { %2953 = vmatprep.mubr.msk.bf16.mxu1 %vm3284_vm0, %v3283_v1  ;;  %2946 = vmatpush3.bf16.msra.mxu0 %v3429_v59 }
  0xe7   : > { %2957 = vmatprep.subr.bf16.mxu0 %v3283_v1  ;;  %2952 = vmatpush3.bf16.msra.mxu1 %v642_v10 }
  0xe8   : > { %2963 = vmatprep.subr.bf16.mxu1 %v3283_v1 }
 0x1a5   : > { %v559_v33 = vpop.f32.mrf.mxu1 }
 0x1a6   : > { %v560_v34 = vadd.f32 %v559_v33, %v3414_v32 }
 0x1a7   : > { %v2943_v35 = vpop.f32.mrf.mxu1 }
 0x1a8   : > { %v567_v37 = vsel %vm566_vm5, %v560_v34, -inf }
 0x1a9   : > { %568 = vmax.xlane.f32.xlu0 %v567_v37  ;;  %v562_v38 = vpop.f32.mrf.mxu1 }
 0x1aa   : > { %v563_v39 = vadd.f32 %v562_v38, %v3417_v36 }
 0x1ab   : > { %v2944_v40 = vpop.f32.mrf.mxu1 }
 0x1ac   : > { %v570_v41 = vsel %vm566_vm5, %v563_v39, -inf }
 0x1ad   : > { %571 = vmax.xlane.f32.xlu0 %v570_v41 }
 0x1c3   : > { %691 = vrot.lane.b32.xlu0 %v3385_v19, %s3286_s29 }
 0x232   : > { %v569_v42 = vpop.xlane.xlu0 %568 }
 0x233   : > { %v573_v43 = vsub.f32 %v560_v34, %v569_v42 }
 0x235   : > { %v575_v44 = vmul.f32 1.442695, %v573_v43 }
 0x236   : > { %v572_v45 = vpop.xlane.xlu0 %571 }
 0x237   : > { %3195 = vpow2.f32 %v575_v44  ;;  %v574_v46 = vsub.f32 %v563_v39, %v572_v45 }
 0x239   : > { %v577_v47 = vmul.f32 1.442695, %v574_v46 }
 0x23a   : > { %v692_v3 = vpop.permute.xlu0 %691 }
 0x23b   : > { %3197 = vpow2.f32 %v577_v47  ;;  %v697_v7 = vsel %vm518_vm2, %v692_v3, 0 }
 0x244   : > { %v3196_v48 = vpop.eup %3195 }
 0x245   : > { %v579_v49 = vsel %vm566_vm5, %v3196_v48, 0.0 }
 0x246   : > { %580 = vadd.xlane.f32.xlu1 %v579_v49 }
 0x248   : > { %v3198_v50 = vpop.eup %3197 }
 0x249   : > { %v582_v51 = vsel %vm566_vm5, %v3198_v50, 0.0 }
 0x24a   : > { %583 = vadd.xlane.f32.xlu1 %v582_v51 }
 0x25b   : > { %688 = vrot.lane.b32.xlu1 %v3393_v24, %s3286_s29 }
 0x2cf   : > { %v581_v60 = vpop.xlane.xlu1 %580 }
 0x2d0   : > { %3199 = vrcp.f32 %v581_v60 }
 0x2d3   : > { %v584_v61 = vpop.xlane.xlu1 %583 }
 0x2d4   : > { %3201 = vrcp.f32 %v584_v61 }
 0x2d7   : > { %v689_v8 = vpop.permute.xlu1 %688 }
 0x2dd   : > { %v3200_v62 = vpop.eup %3199 }
 0x2de   : > { %v587_v0 = vmul.f32 %v3200_v62, %v3196_v48 }
 0x2e1   : > { %v3202_v63 = vpop.eup %3201 }
 0x2e2   : > { %v588_v2 = vmul.f32 %v3202_v63, %v3198_v50 }
 0x2e4   : > { %v589_v4 = vpack.c.bf16 %v588_v2, %v587_v0 }
 0x2e6   : > { %2948 = vmatmul.mubr.msk.bf16.vlgmr.msra.gmra.mxu0 %vm566_vm5, %v589_v4 }
 0x2e7   : > { %2958 = vmatpush3.bf16.xpose.msra.mxu0 %v697_v7  ;;  %2959 = vmatprep.mubr.msk.bf16.mxu0 %vm3284_vm0, %v3283_v1 }
 0x2e8   : > { %2969 = vmatprep.subr.bf16.mxu0 %v3283_v1 }
 0x2ee   : > { %2960 = vmatmul.mubr.msk.bf16.vlgmr.msra.gmra.mxu0 %vm518_vm2, %v689_v8 }
 0x2ef   : > { %2971 = vmatprep.mubr.msk.bf16.mxu0 %vm3284_vm0, %v3283_v1  ;;  %2970 = vmatpush3.bf16.msra.mxu0 %v818_v55 }
 0x2f0   : > { %2981 = vmatprep.subr.bf16.mxu0 %v3283_v1 }
 0x3a6   : > { %v628_v11 = vpop.f32.mrf.mxu0 }
 0x3a8   : > { %v2949_v12 = vpop.f32.mrf.mxu0 }
 0x3aa   : > { %v631_v13 = vpop.f32.mrf.mxu0 }
 0x3ab   : > { %v635_v14 = vpack.c.bf16 %v631_v13, %v628_v11 }
 0x3ac   : > { %v2950_v15 = vpop.f32.mrf.mxu0 }
 0x3ad   : > { %2954 = vmatmul.mubr.msk.bf16.vlgmr.msra.gmra.mxu1 %vm518_vm2, %v635_v14 }
 0x3ae   : > { %v733_v16 = vpop.f32.mrf.mxu0  ;;  %2965 = vmatprep.mubr.msk.bf16.mxu1 %vm3284_vm0, %v3283_v1 }
 0x3af   : > { %v734_v17 = vadd.f32 %v733_v16, %v3414_v32 }
 0x3b0   : > { %v2961_v18 = vpop.f32.mrf.mxu0 }
 0x3b1   : > { %v740_v20 = vsel %vm566_vm5, %v734_v17, -inf }
 0x3b2   : > { %741 = vmax.xlane.f32.xlu1 %v740_v20  ;;  %v736_v21 = vpop.f32.mrf.mxu0 }
 0x3b3   : > { %v737_v22 = vadd.f32 %v736_v21, %v3417_v36 }
 0x3b4   : > { %v2962_v23 = vpop.f32.mrf.mxu0 }
 0x3b5   : > { %v743_v25 = vsel %vm566_vm5, %v737_v22, -inf }
 0x3b6   : > { %744 = vmax.xlane.f32.xlu0 %v743_v25 }
 0x43b   : > { %v742_v26 = vpop.xlane.xlu1 %741 }
 0x43c   : > { %v746_v27 = vsub.f32 %v734_v17, %v742_v26 }
 0x43e   : > { %v748_v29 = vmul.f32 1.442695, %v746_v27 }
 0x43f   : > { %v745_v30 = vpop.xlane.xlu0 %744 }
 0x440   : > { %3203 = vpow2.f32 %v748_v29  ;;  %v747_v31 = vsub.f32 %v737_v22, %v745_v30 }
 0x442   : > { %v750_v33 = vmul.f32 1.442695, %v747_v31 }
 0x444   : > { %3205 = vpow2.f32 %v750_v33 }
 0x44d   : > { %v3204_v34 = vpop.eup %3203 }
 0x44e   : > { %v752_v35 = vsel %vm566_vm5, %v3204_v34, 0.0 }
 0x44f   : > { %753 = vadd.xlane.f32.xlu0 %v752_v35 }
 0x451   : > { %v3206_v37 = vpop.eup %3205 }
 0x452   : > { %v755_v38 = vsel %vm566_vm5, %v3206_v37, 0.0 }
 0x453   : > { %756 = vadd.xlane.f32.xlu1 %v755_v38 }
 0x464   : > { %865 = vrot.lane.b32.xlu1 %v3385_v19, %s3287_s12 }
 0x465   : > { %764 = vrot.lane.b32.xlu0 %v3429_v59, %s3286_s29 }
 0x468   : > { %863 = vrot.lane.b32.xlu1 %v3393_v24, %s3287_s12 }
 0x46d   : > { %v3463_v39 = vpop.f32.mrf.mxu1 }
 0x46f   : > { %v2955_v40 = vpop.f32.mrf.mxu1 }
 0x471   : > { %v3465_v41 = vpop.f32.mrf.mxu1 }
 0x473   : > { %v2956_v42 = vpop.f32.mrf.mxu1 }
 0x474   : > { %v2727_v42 = vld [vmem:[%s3858_s2 + $0x8] sm:$0xf] }
 0x4d8   : > { %v754_v43 = vpop.xlane.xlu0 %753 }
 0x4d9   : > { %3207 = vrcp.f32 %v754_v43  ;;  %v991_v43 = vsel %vm640_vm6, %v2727_v42, 0 }
 0x4dc   : > { %v757_v44 = vpop.xlane.xlu1 %756  ;;  %v765_v45 = vpop.permute.xlu0 %764 }
 0x4dd   : > { %3209 = vrcp.f32 %v757_v44  ;;  %2964 = vmatpush3.bf16.msra.mxu1 %v765_v45 }
 0x4de   : > { %2975 = vmatprep.subr.bf16.mxu1 %v3283_v1 }
 0x4e0   : > { %v866_v50 = vpop.permute.xlu1 %865 }
 0x4e1   : > { %v871_v52 = vsel %vm518_vm2, %v866_v50, 0 }
 0x4e4   : > { %v864_v53 = vpop.permute.xlu1 %863 }
 0x4e6   : > { %v3208_v46 = vpop.eup %3207 }
 0x4e7   : > { %v760_v48 = vmul.f32 %v3208_v46, %v3204_v34 }
 0x4ea   : > { %v3210_v47 = vpop.eup %3209 }
 0x4eb   : > { %v761_v49 = vmul.f32 %v3210_v47, %v3206_v37 }
 0x4ed   : > { %v762_v51 = vpack.c.bf16 %v761_v49, %v760_v48 }
 0x4ef   : > { %2966 = vmatmul.mubr.msk.bf16.vlgmr.msra.gmra.mxu1 %vm566_vm5, %v762_v51 }
 0x4f0   : > { %2976 = vmatpush3.bf16.xpose.msra.mxu1 %v871_v52  ;;  %2977 = vmatprep.mubr.msk.bf16.mxu1 %vm3284_vm0, %v3283_v1 }
 0x4f1   : > { %2987 = vmatprep.subr.bf16.mxu1 %v3283_v1 }
 0x4f7   : > { %2978 = vmatmul.mubr.msk.bf16.vlgmr.msra.gmra.mxu1 %vm518_vm2, %v864_v53 }
 0x4f8   : > { %2989 = vmatprep.mubr.msk.bf16.mxu1 %vm3284_vm0, %v3283_v1  ;;  %2988 = vmatpush3.bf16.msra.mxu1 %v991_v43 }
 0x4f9   : > { %2999 = vmatprep.subr.bf16.mxu1 %v3283_v1 }
 0x5af   : > { %v804_v56 = vpop.f32.mrf.mxu1 }
 0x5b1   : > { %v2967_v57 = vpop.f32.mrf.mxu1 }
 0x5b3   : > { %v807_v58 = vpop.f32.mrf.mxu1 }
 0x5b4   : > { %v811_v60 = vpack.c.bf16 %v807_v58, %v804_v56 }
 0x5b5   : > { %v2968_v61 = vpop.f32.mrf.mxu1 }
 0x5b6   : > { %2972 = vmatmul.mubr.msk.bf16.vlgmr.msra.gmra.mxu0 %vm518_vm2, %v811_v60 }
 0x5b7   : > { %v907_v62 = vpop.f32.mrf.mxu1  ;;  %2983 = vmatprep.mubr.msk.bf16.mxu0 %vm3284_vm0, %v3283_v1 }
 0x5b8   : > { %v908_v63 = vadd.f32 %v907_v62, %v3414_v32 }
 0x5b9   : > { %v2979_v0 = vpop.f32.mrf.mxu1 }
 0x5ba   : > { %v914_v2 = vsel %vm566_vm5, %v908_v63, -inf }
 0x5bb   : > { %915 = vmax.xlane.f32.xlu1 %v914_v2  ;;  %v910_v3 = vpop.f32.mrf.mxu1 }
 0x5bc   : > { %v911_v4 = vadd.f32 %v910_v3, %v3417_v36 }
 0x5bd   : > { %v2980_v7 = vpop.f32.mrf.mxu1 }
 0x5be   : > { %v917_v8 = vsel %vm566_vm5, %v911_v4, -inf }
 0x5bf   : > { %918 = vmax.xlane.f32.xlu0 %v917_v8 }
 0x5cc   : > { %937 = vrot.lane.b32.xlu1 %v3429_v59, %s3287_s12 }
 0x5d0   : > { %1036 = vrot.lane.b32.xlu1 %v3393_v24, %s3288_s15  ;;  %v2717_v24 = vld [vmem:[%s3861_s5 + $0x3] ss:$0 sm:$0xff] }
 0x5d1   : > { %v514_v21 = vadd.f32 %v2717_v24, %v3369_v5  ;;  %v515_v23 = vadd.f32 %v2717_v24, %v3371_v6 }
 0x5d3   : > { %v685_v22 = vadd.f32 %v3463_v39, %v514_v21  ;;  %v686_v29 = vadd.f32 %v3465_v41, %v515_v23 }
 0x644   : > { %v916_v9 = vpop.xlane.xlu1 %915 }
 0x645   : > { %v920_v10 = vsub.f32 %v908_v63, %v916_v9 }
 0x647   : > { %v922_v11 = vmul.f32 1.442695, %v920_v10 }
 0x648   : > { %v938_v12 = vpop.permute.xlu1 %937  ;;  %v919_v13 = vpop.xlane.xlu0 %918 }
 0x649   : > { %3211 = vpow2.f32 %v922_v11  ;;  %v921_v14 = vsub.f32 %v911_v4, %v919_v13  ;;  %2982 = vmatpush3.bf16.msra.mxu0 %v938_v12 }
 0x64a   : > { %2993 = vmatprep.subr.bf16.mxu0 %v3283_v1 }
 0x64b   : > { %v924_v15 = vmul.f32 1.442695, %v921_v14 }
 0x64c   : > { %v1037_v41 = vpop.permute.xlu1 %1036 }
 0x64d   : > { %3213 = vpow2.f32 %v924_v15 }
 0x656   : > { %v3212_v16 = vpop.eup %3211 }
 0x657   : > { %v926_v17 = vsel %vm566_vm5, %v3212_v16, 0.0 }
 0x658   : > { %927 = vadd.xlane.f32.xlu0 %v926_v17 }
 0x65a   : > { %v3214_v18 = vpop.eup %3213 }
 0x65b   : > { %v929_v20 = vsel %vm566_vm5, %v3214_v18, 0.0 }
 0x65c   : > { %930 = vadd.xlane.f32.xlu0 %v929_v20 }
 0x672   : > { %1038 = vrot.lane.b32.xlu0 %v3385_v19, %s3288_s15 }
 0x676   : > { %v854_v25 = vpop.f32.mrf.mxu0 }
 0x677   : > { %v861_v26 = vadd.f32 %v854_v25, %v685_v22 }
 0x678   : > { %v2973_v27 = vpop.f32.mrf.mxu0 }
 0x67a   : > { %v857_v30 = vpop.f32.mrf.mxu0 }
 0x67b   : > { %v862_v31 = vadd.f32 %v857_v30, %v686_v29 }
 0x67c   : > { %v2974_v33 = vpop.f32.mrf.mxu0 }
 0x6e1   : > { %v928_v34 = vpop.xlane.xlu0 %927 }
 0x6e2   : > { %3215 = vrcp.f32 %v928_v34 }
 0x6e5   : > { %v931_v35 = vpop.xlane.xlu0 %930 }
 0x6e6   : > { %3217 = vrcp.f32 %v931_v35 }
 0x6e9   : > { %v1039_v40 = vpop.permute.xlu0 %1038 }
 0x6ea   : > { %v1044_v6 = vsel %vm518_vm2, %v1039_v40, 0 }
 0x6ef   : > { %v3216_v5 = vpop.eup %3215 }
 0x6f0   : > { %v934_v38 = vmul.f32 %v3216_v5, %v3212_v16 }
 0x6f3   : > { %v3218_v37 = vpop.eup %3217 }
 0x6f4   : > { %v935_v19 = vmul.f32 %v3218_v37, %v3214_v18 }
 0x6f6   : > { %v936_v39 = vpack.c.bf16 %v935_v19, %v934_v38 }
 0x6f8   : > { %2984 = vmatmul.mubr.msk.bf16.vlgmr.msra.gmra.mxu0 %vm566_vm5, %v936_v39 }
 0x6f9   : > { %2994 = vmatpush3.bf16.xpose.msra.mxu0 %v1044_v6  ;;  %2995 = vmatprep.mubr.msk.bf16.mxu0 %vm3284_vm0, %v3283_v1 }
 0x6fa   : > { %3005 = vmatprep.subr.bf16.mxu0 %v3283_v1 }
 0x700   : > { %2996 = vmatmul.mubr.msk.bf16.vlgmr.msra.gmra.mxu0 %vm518_vm2, %v1037_v41 }
 0x701   : > { %3007 = vmatprep.mubr.msk.bf16.mxu0 %vm3284_vm0, %v3283_v1 }
 0x7b8   : > { %v977_v44 = vpop.f32.mrf.mxu0 }
 0x7ba   : > { %v2985_v45 = vpop.f32.mrf.mxu0 }
 0x7bc   : > { %v980_v46 = vpop.f32.mrf.mxu0 }
 0x7bd   : > { %v984_v47 = vpack.c.bf16 %v980_v46, %v977_v44  ;;  %v3175_v46 = vld [vmem:[%s3859_s3 + $0x8] sm:$0xff]  }
 0x7be   : > { %v2986_v48 = vpop.f32.mrf.mxu0 }
 0x7bf   : > { %2990 = vmatmul.mubr.msk.bf16.vlgmr.msra.gmra.mxu1 %vm518_vm2, %v984_v47  ;;  %v3176_v47 = vld [vmem:[%s3859_s3] sm:$0xff]   ;;  %v3177_v48 = vld [vmem:[%s3860_s4 + $0x18] sm:$0xff]  }
 0x7c0   : > { %v1080_v49 = vpop.f32.mrf.mxu0  ;;  %3001 = vmatprep.mubr.msk.bf16.mxu1 %vm3284_vm0, %v3283_v1 }
 0x7c1   : > { %v1081_v50 = vadd.f32 %v1080_v49, %v3414_v32 }
 0x7c2   : > { %v2997_v51 = vpop.f32.mrf.mxu0 }
 0x7c3   : > { %v1087_v52 = vsel %vm566_vm5, %v1081_v50, -inf }
 0x7c4   : > { %1088 = vmax.xlane.f32.xlu1 %v1087_v52  ;;  %v1083_v53 = vpop.f32.mrf.mxu0 }
 0x7c5   : > { %v1084_v54 = vadd.f32 %v1083_v53, %v3417_v36 }
 0x7c6   : > { %v2998_v55 = vpop.f32.mrf.mxu0 }
 0x7c7   : > { %v1090_v56 = vsel %vm566_vm5, %v1084_v54, -inf }
 0x7c8   : > { %1091 = vmax.xlane.f32.xlu0 %v1090_v56 }
 0x84d   : > { %v1089_v57 = vpop.xlane.xlu1 %1088 }
 0x84e   : > { %v1093_v58 = vsub.f32 %v1081_v50, %v1089_v57  ;;  %v2733_v57 = vld [vmem:[%s3861_s5 + $0x4] ss:$0 sm:$0xff] }
 0x850   : > { %v1095_v60 = vmul.f32 1.442695, %v1093_v58 }
 0x851   : > { %v1092_v61 = vpop.xlane.xlu0 %1091 }
 0x852   : > { %3219 = vpow2.f32 %v1095_v60  ;;  %v1094_v62 = vsub.f32 %v1084_v54, %v1092_v61 }
 0x854   : > { %v1097_v63 = vmul.f32 1.442695, %v1094_v62  ;;  %v2734_v62 = vld [vmem:[%s3861_s5 + $0x5] ss:$0 sm:$0xff] }
 0x856   : > { %3221 = vpow2.f32 %v1097_v63 }
 0x85f   : > { %v3220_v0 = vpop.eup %3219 }
 0x860   : > { %v1099_v2 = vsel %vm566_vm5, %v3220_v0, 0.0 }
 0x861   : > { %1100 = vadd.xlane.f32.xlu0 %v1099_v2 }
 0x863   : > { %v3222_v3 = vpop.eup %3221 }
 0x864   : > { %v1102_v4 = vsel %vm566_vm5, %v3222_v3, 0.0 }
 0x865   : > { %1103 = vadd.xlane.f32.xlu1 %v1102_v4  ;;  %v3178_v4 = vld [vmem:[%s3860_s4 + $0x10] sm:$0xff]  }
 0x877   : > { %1110 = vrot.lane.b32.xlu0 %v3429_v59, %s3288_s15  ;;  %v2731_v59 = vld [vmem:[%s3858_s2 + $0xc] sm:$0xf] }
 0x878   : > { %v1164_v21 = vsel %vm640_vm6, %v2731_v59, 0 }
 0x879   : > { %3006 = vmatpush3.bf16.msra.mxu0 %v1164_v21 }
 0x87a   : > { %3019 = vmatprep.subr.bf16.mxu0 %v3283_v1 }
 0x87f   : > { %v1027_v7 = vpop.f32.mrf.mxu1 }
 0x880   : > { %v1034_v8 = vadd.f32 %v1027_v7, %v861_v26  ;;  %v3179_v7 = vld [vmem:[%s3860_s4 + $0x8] sm:$0xff]  }
 0x881   : > { %v2991_v9 = vpop.f32.mrf.mxu1 }
 0x882   : > { %v2735_v9 = vld [vmem:[%s3861_s5 + $0x8] ss:$0 sm:$0xff] }
 0x883   : > { %v1030_v10 = vpop.f32.mrf.mxu1 }
 0x884   : > { %v1035_v11 = vadd.f32 %v1030_v10, %v862_v31 }
 0x885   : > { %v2992_v12 = vpop.f32.mrf.mxu1 }
 0x8ea   : > { %v1101_v13 = vpop.xlane.xlu0 %1100 }
 0x8eb   : > { %3223 = vrcp.f32 %v1101_v13 }
 0x8ee   : > { %v1104_v14 = vpop.xlane.xlu1 %1103  ;;  %v1111_v15 = vpop.permute.xlu0 %1110 }
 0x8ef   : > { %3225 = vrcp.f32 %v1104_v14  ;;  %3000 = vmatpush3.bf16.msra.mxu1 %v1111_v15 }
 0x8f0   : > { %3011 = vmatprep.subr.bf16.mxu1 %v3283_v1 }
 0x8f8   : > { %v3224_v16 = vpop.eup %3223 }
 0x8f9   : > { %v1107_v18 = vmul.f32 %v3224_v16, %v3220_v0 }
 0x8fc   : > { %v3226_v17 = vpop.eup %3225 }
 0x8fd   : > { %v1108_v20 = vmul.f32 %v3226_v17, %v3222_v3 }
 0x8ff   : > { %v1109_v24 = vpack.c.bf16 %v1108_v20, %v1107_v18  ;;  %v2739_v20 = vld [vmem:[%s3861_s5 + $0x9] ss:$0 sm:$0xff] }
 0x901   : > { %3002 = vmatmul.mubr.msk.bf16.vlgmr.msra.gmra.mxu1 %vm566_vm5, %v1109_v24 }
 0x902   : > { %3015 = vmatprep.mubr.msk.bf16.mxu1 %vm3284_vm0, %v3283_v1  ;;  %3012 = vmatpush3.bf16.msra.mxu1 %v3175_v46 }
 0x903   : > { %3013 = vmatprep.subr.bf16.mxu1 %v3283_v1 }
 0x906   : > { %3014 = vmatpush3.bf16.msra.mxu1 %v3176_v47 }
 0x907   : > { %3031 = vmatprep.subr.bf16.mxu1 %v3283_v1 }
 0x9c1   : > { %v1150_v22 = vpop.f32.mrf.mxu1 }
 0x9c3   : > { %v3003_v23 = vpop.f32.mrf.mxu1 }
 0x9c5   : > { %v1153_v25 = vpop.f32.mrf.mxu1 }
 0x9c6   : > { %v1157_v26 = vpack.c.bf16 %v1153_v25, %v1150_v22 }
 0x9c7   : > { %v3004_v27 = vpop.f32.mrf.mxu1 }
 0x9c8   : > { %3008 = vmatmul.mubr.msk.bf16.vlgmr.msra.gmra.mxu0 %vm518_vm2, %v1157_v26 }
 0x9c9   : > { %3027 = vmatprep.mubr.msk.bf16.mxu0 %vm3284_vm0, %v3283_v1  ;;  %3020 = vmatpush3.bf16.msra.mxu0 %v3177_v48 }
 0x9ca   : > { %3021 = vmatprep.subr.bf16.mxu0 %v3283_v1 }
 0x9cd   : > { %3022 = vmatpush3.bf16.msra.mxu0 %v3178_v4  ;;  %v2770_v4 = vld [vmem:[%s3861_s5 + $0x12] ss:$0 sm:$0xff] }
 0x9ce   : > { %3023 = vmatprep.subr.bf16.mxu0 %v3283_v1 }
 0x9d1   : > { %3024 = vmatpush3.bf16.msra.mxu0 %v3179_v7 }
 0x9d2   : > { %3025 = vmatprep.subr.bf16.mxu0 %v3283_v1 }
 0xa88   : > { %v1200_v29 = vpop.f32.mrf.mxu0 }
 0xa89   : > { %v1207_v30 = vadd.f32 %v1200_v29, %v1034_v8  ;;  %v3180_v8 = vld [vmem:[%s3860_s4] sm:$0xff]  }
 0xa8a   : > { %v3009_v31 = vpop.f32.mrf.mxu0  ;;  %3026 = vmatpush3.bf16.msra.mxu0 %v3180_v8 }
 0xa8b   : > { %v1211_v33 = vsel %vm338_vm1, %v1207_v30, 0.0  ;;  %3047 = vmatprep.subr.bf16.mxu0 %v3283_v1 }
 0xa8c   : > { %1212 = vadd.xlane.f32.xlu1 %v1211_v33  ;;  %v1203_v34 = vpop.f32.mrf.mxu0 }
 0xa8d   : > { %v1208_v35 = vadd.f32 %v1203_v34, %v1035_v11 }
 0xa8e   : > { %v3010_v5 = vpop.f32.mrf.mxu0 }
 0xa8f   : > { %v1214_v37 = vsel %vm338_vm1, %v1208_v35, 0.0 }
 0xa90   : > { %1215 = vadd.xlane.f32.xlu1 %v1214_v37 }
 0xb15   : > { %v1213_v38 = vpop.xlane.xlu1 %1212 }
 0xb16   : > { %v1218_v19 = vmul.f32 0.03125, %v1213_v38 }
 0xb18   : > { %v1220_v40 = vsub.f32 %v1207_v30, %v1218_v19 }
 0xb19   : > { %v1216_v39 = vpop.xlane.xlu1 %1215 }
 0xb1a   : > { %v1219_v6 = vmul.f32 0.03125, %v1216_v39  ;;  %v1222_v41 = vmul.f32 %v1220_v40, %v1220_v40 }
 0xb1c   : > { %v1221_v42 = vsub.f32 %v1208_v35, %v1219_v6  ;;  %v1224_v43 = vsel %vm338_vm1, %v1222_v41, 0.0  ;;  %v3181_v6 = vld [vmem:[%s3857_s1 + $0x38] sm:$0xff]  }
 0xb1d   : > { %1225 = vadd.xlane.f32.xlu1 %v1224_v43  ;;  %v3182_v41 = vld [vmem:[%s3857_s1 + $0x58] sm:$0xff]   ;;  %v3184_v43 = vld [vmem:[%s3857_s1 + $0x50] sm:$0xff]  }
 0xb1e   : > { %v1223_v44 = vmul.f32 %v1221_v42, %v1221_v42 }
 0xb20   : > { %v1227_v45 = vsel %vm338_vm1, %v1223_v44, 0.0 }
 0xb21   : > { %1228 = vadd.xlane.f32.xlu1 %v1227_v45 }
 0xba6   : > { %v1226_v49 = vpop.xlane.xlu1 %1225 }
 0xba7   : > { %v1230_v50 = vmul.f32 0.03125, %v1226_v49 }
 0xba9   : > { %v1232_v51 = vadd.f32 1e-05, %v1230_v50 }
 0xbaa   : > { %v1229_v52 = vpop.xlane.xlu1 %1228 }
 0xbab   : > { %3227 = vrsqrt.f32 %v1232_v51  ;;  %v1231_v53 = vmul.f32 0.03125, %v1229_v52  ;;  %v2745_v52 = vld [vmem:[%s3861_s5 + $0x6] ss:$0 sm:$0xff] }
 0xbad   : > { %v1233_v54 = vadd.f32 1e-05, %v1231_v53 }
 0xbaf   : > { %3229 = vrsqrt.f32 %v1233_v54 }
 0xbb8   : > { %v3228_v55 = vpop.eup %3227 }
 0xbb9   : > { %v1236_v56 = vmul.f32 %v3228_v55, %v1220_v40 }
 0xbbb   : > { %v1242_v61 = vmul.f32 %v2733_v57, %v1236_v56  ;;  %v2746_v56 = vld [vmem:[%s3861_s5 + $0x7] ss:$0 sm:$0xff] }
 0xbbc   : > { %v3230_v58 = vpop.eup %3229 }
 0xbbd   : > { %v1237_v60 = vmul.f32 %v3230_v58, %v1221_v42  ;;  %v1248_v0 = vadd.f32 %v2734_v62, %v1242_v61  ;;  %v3183_v42 = vld [vmem:[%s3857_s1 + $0x30] sm:$0xff]   ;;  %v3185_v61 = vld [vmem:[%s3857_s1 + $0x48] sm:$0xff]  }
 0xbbf   : > { %v1243_v63 = vmul.f32 %v2733_v57, %v1237_v60 }
 0xbc1   : > { %v1249_v2 = vadd.f32 %v2734_v62, %v1243_v63  ;;  %v3186_v63 = vld [vmem:[%s3857_s1 + $0x40] sm:$0xff]  }
 0xbc3   : > { %v1250_v3 = vpack.c.bf16 %v1249_v2, %v1248_v0 }
 0xbc5   : > { %3016 = vmatmul.mubr.msk.bf16.vlgmr.msra.gmra.mxu1 %vm338_vm1, %v1250_v3  ;;  %v2752_v3 = vld [vmem:[%s3861_s5 + $0x10] ss:$0 sm:$0xff] }
 0xbc6   : > { %3035 = vmatprep.mubr.msk.bf16.mxu1 %vm3284_vm0, %v3283_v1  ;;  %3032 = vmatpush3.bf16.msra.mxu1 %v3181_v6 }
 0xbc7   : > { %3033 = vmatprep.subr.bf16.mxu1 %v3283_v1 }
 0xbca   : > { %3034 = vmatpush3.bf16.msra.mxu1 %v3183_v42 }
 0xbcb   : > { %3039 = vmatprep.subr.bf16.mxu1 %v3283_v1 }
 0xc85   : > { %v1309_v10 = vpop.f32.mrf.mxu1 }
 0xc86   : > { %v1310_v12 = vadd.f32 %v2735_v9, %v1309_v10 }
 0xc87   : > { %v3017_v11 = vpop.f32.mrf.mxu1 }
 0xc88   : > { %v1316_v16 = vmax.f32 %v1310_v12, 0.0 }
 0xc89   : > { %v1312_v13 = vpop.f32.mrf.mxu1 }
 0xc8a   : > { %v1313_v14 = vadd.f32 %v2735_v9, %v1312_v13 }
 0xc8b   : > { %v3018_v15 = vpop.f32.mrf.mxu1 }
 0xc8c   : > { %v1317_v17 = vmax.f32 %v1313_v14, 0.0 }
 0xc8e   : > { %v1318_v18 = vpack.c.bf16 %v1317_v17, %v1316_v16 }
 0xc90   : > { %3028 = vmatmul.mubr.msk.bf16.vlgmr.msra.gmra.mxu0 %vm1356_vm7, %v1318_v18 }
 0xc91   : > { %3051 = vmatprep.mubr.msk.bf16.mxu0 %vm3284_vm0, %v3283_v1  ;;  %3048 = vmatpush3.bf16.msra.mxu0 %v3182_v41 }
 0xc92   : > { %3049 = vmatprep.subr.bf16.mxu0 %v3283_v1 }
 0xc95   : > { %3050 = vmatpush3.bf16.msra.mxu0 %v3184_v43 }
 0xc96   : > { %3061 = vmatprep.subr.bf16.mxu0 %v3283_v1 }
 0xd50   : > { %v1394_v24 = vpop.f32.mrf.mxu0 }
 0xd51   : > { %v1395_v59 = vadd.f32 %v2739_v20, %v1394_v24  ;;  %v2761_v24 = vld [vmem:[%s3861_s5 + $0x11] ss:$0 sm:$0xff] }
 0xd52   : > { %v3029_v21 = vpop.f32.mrf.mxu0 }
 0xd53   : > { %v1401_v22 = vadd.f32 %v1395_v59, %v1248_v0 }
 0xd54   : > { %v1397_v23 = vpop.f32.mrf.mxu0 }
 0xd55   : > { %v1398_v25 = vadd.f32 %v2739_v20, %v1397_v23  ;;  %v1405_v26 = vsel %vm338_vm1, %v1401_v22, 0.0 }
 0xd56   : > { %1406 = vadd.xlane.f32.xlu1 %v1405_v26  ;;  %v3030_v27 = vpop.f32.mrf.mxu0 }
 0xd57   : > { %v1402_v29 = vadd.f32 %v1398_v25, %v1249_v2 }
 0xd59   : > { %v1408_v30 = vsel %vm338_vm1, %v1402_v29, 0.0 }
 0xd5a   : > { %1409 = vadd.xlane.f32.xlu1 %v1408_v30 }
 0xddf   : > { %v1407_v31 = vpop.xlane.xlu1 %1406 }
 0xde0   : > { %v1411_v33 = vmul.f32 0.03125, %v1407_v31 }
 0xde2   : > { %v1413_v34 = vsub.f32 %v1401_v22, %v1411_v33 }
 0xde3   : > { %v1410_v35 = vpop.xlane.xlu1 %1409 }
 0xde4   : > { %v1412_v5 = vmul.f32 0.03125, %v1410_v35  ;;  %v1415_v37 = vmul.f32 %v1413_v34, %v1413_v34 }
 0xde6   : > { %v1414_v38 = vsub.f32 %v1402_v29, %v1412_v5  ;;  %v1417_v19 = vsel %vm338_vm1, %v1415_v37, 0.0 }
 0xde7   : > { %1418 = vadd.xlane.f32.xlu0 %v1417_v19 }
 0xde8   : > { %v1416_v40 = vmul.f32 %v1414_v38, %v1414_v38 }
 0xdea   : > { %v1420_v39 = vsel %vm338_vm1, %v1416_v40, 0.0 }
 0xdeb   : > { %1421 = vadd.xlane.f32.xlu1 %v1420_v39 }
 0xe70   : > { %v1419_v44 = vpop.xlane.xlu0 %1418 }
 0xe71   : > { %v1423_v45 = vmul.f32 0.03125, %v1419_v44 }
 0xe73   : > { %v1425_v46 = vadd.f32 1e-05, %v1423_v45 }
 0xe74   : > { %v1422_v47 = vpop.xlane.xlu1 %1421 }
 0xe75   : > { %3231 = vrsqrt.f32 %v1425_v46  ;;  %v1424_v48 = vmul.f32 0.03125, %v1422_v47 }
 0xe77   : > { %v1426_v49 = vadd.f32 1e-05, %v1424_v48 }
 0xe79   : > { %3233 = vrsqrt.f32 %v1426_v49 }
 0xe82   : > { %v3232_v50 = vpop.eup %3231 }
 0xe83   : > { %v1429_v51 = vmul.f32 %v3232_v50, %v1413_v34 }
 0xe85   : > { %v1435_v55 = vmul.f32 %v2745_v52, %v1429_v51 }
 0xe86   : > { %v3234_v53 = vpop.eup %3233 }
 0xe87   : > { %v1430_v54 = vmul.f32 %v3234_v53, %v1414_v38  ;;  %v3612_v58 = vadd.f32 %v2746_v56, %v1435_v55 }
 0xe89   : > { %v1436_v57 = vmul.f32 %v2745_v52, %v1430_v54 }
 0xe8b   : > { %v3614_v60 = vadd.f32 %v2746_v56, %v1436_v57  ;;  %v2778_v56 = vld [vmem:[%s3858_s2 + $0x10] sm:$0xf] }
 0xe8c   : > { %v1768_v57 = vsel %vm640_vm6, %v2778_v56, 0 }
 0xe8d   : > { %v1443_v62 = vpack.c.bf16 %v3614_v60, %v3612_v58 }
 0xe8f   : > { %3036 = vmatmul.mubr.msk.bf16.vlgmr.msra.gmra.mxu1 %vm338_vm1, %v1443_v62  ;;  %3052 = vmatmul.mubr.msk.bf16.vlgmr.msra.gmra.mxu0 %vm338_vm1, %v1443_v62 }
 0xe90   : > { %3040 = vmatpush3.bf16.msra.mxu1 %v3185_v61  ;;  %3043 = vmatprep.mubr.msk.bf16.mxu1 %vm3284_vm0, %v3283_v1 }
 0xe91   : > { %3041 = vmatprep.subr.bf16.mxu1 %v3283_v1  ;;  %3063 = vmatprep.mubr.msk.bf16.mxu0 %vm3284_vm0, %v3283_v1 }
 0xe94   : > { %3042 = vmatpush3.bf16.msra.mxu1 %v3186_v63 }
 0xe95   : > { %3055 = vmatprep.subr.bf16.mxu1 %v3283_v1 }
 0xe97   : > { %3044 = vmatmul.mubr.msk.bf16.vlgmr.msra.gmra.mxu1 %vm338_vm1, %v1443_v62 }
 0xe98   : > { %3057 = vmatprep.mubr.msk.bf16.mxu1 %vm3284_vm0, %v3283_v1 }
 0xf4f   : > { %v1504_v0 = vpop.f32.mrf.mxu1  ;;  %v1630_v2 = vpop.f32.mrf.mxu0 }
 0xf50   : > { %v1505_v11 = vadd.f32 %v2752_v3, %v1504_v0  ;;  %v1631_v12 = vadd.f32 %v2770_v4, %v1630_v2 }
 0xf51   : > { %v3037_v7 = vpop.f32.mrf.mxu1  ;;  %v3053_v8 = vpop.f32.mrf.mxu0 }
 0xf53   : > { %v1507_v9 = vpop.f32.mrf.mxu1  ;;  %v1633_v10 = vpop.f32.mrf.mxu0 }
 0xf54   : > { %v1508_v13 = vadd.f32 %v2752_v3, %v1507_v9  ;;  %v1634_v14 = vadd.f32 %v2770_v4, %v1633_v10 }
 0xf55   : > { %v3038_v15 = vpop.f32.mrf.mxu1  ;;  %v3054_v16 = vpop.f32.mrf.mxu0 }
 0xf56   : > { %v3641_v17 = vpack.c.bf16 %v1508_v13, %v1505_v11  ;;  %v3643_v18 = vpack.c.bf16 %v1634_v14, %v1631_v12 }
 0xf57   : > { %v1567_v20 = vpop.f32.mrf.mxu1 }
 0xf58   : > { %1814 = vrot.lane.b32.xlu0 %v3641_v17, %s3286_s29  ;;  %3062 = vmatpush3.bf16.msra.mxu0 %v3643_v18  ;;  %v1568_v22 = vadd.f32 %v2761_v24, %v1567_v20 }
 0xf59   : > { %v3045_v59 = vpop.f32.mrf.mxu1  ;;  %3073 = vmatprep.subr.bf16.mxu0 %v3283_v1 }
 0xf5b   : > { %v1570_v21 = vpop.f32.mrf.mxu1 }
 0xf5c   : > { %v1571_v23 = vadd.f32 %v2761_v24, %v1570_v21 }
 0xf5d   : > { %v3046_v25 = vpop.f32.mrf.mxu1 }
 0xf5e   : > { %v3652_v26 = vpack.c.bf16 %v1571_v23, %v1568_v22  ;;  %v2775_v25 = vld [vmem:[%s3861_s5 + $0x13] ss:$0 sm:$0xff] }
 0xf60   : > { %v1650_v27 = vsel %vm518_vm2, %v3652_v26, 0 }
 0xf61   : > { %3056 = vmatpush3.bf16.xpose.msra.mxu1 %v1650_v27  ;;  %v1642_v27 = vadd.f32 %v2775_v25, %v3612_v58 }
 0xf62   : > { %3067 = vmatprep.subr.bf16.mxu1 %v3283_v1 }
 0xf68   : > { %3058 = vmatmul.mubr.msk.bf16.vlgmr.msra.gmra.mxu1 %vm518_vm2, %v3641_v17 }
 0xf69   : > { %3069 = vmatprep.mubr.msk.bf16.mxu1 %vm3284_vm0, %v3283_v1  ;;  %3068 = vmatpush3.bf16.msra.mxu1 %v1768_v57 }
 0xf6a   : > { %3079 = vmatprep.subr.bf16.mxu1 %v3283_v1 }
 0xfca   : > { %v1815_v55 = vpop.permute.xlu0 %1814 }
0x1028   : > { %v1686_v29 = vpop.f32.mrf.mxu1 }
0x1029   : > { %v1687_v30 = vadd.f32 %v1686_v29, %v3414_v32 }
0x102a   : > { %v3059_v31 = vpop.f32.mrf.mxu1 }
0x102b   : > { %v1693_v33 = vsel %vm566_vm5, %v1687_v30, -inf }
0x102c   : > { %1694 = vmax.xlane.f32.xlu1 %v1693_v33  ;;  %v1689_v34 = vpop.f32.mrf.mxu1  ;;  %v1643_v33 = vadd.f32 %v2775_v25, %v3614_v60 }
0x102d   : > { %v1690_v35 = vadd.f32 %v1689_v34, %v3417_v36 }
0x102e   : > { %v3060_v5 = vpop.f32.mrf.mxu1 }
0x102f   : > { %v1696_v37 = vsel %vm566_vm5, %v1690_v35, -inf }
0x1030   : > { %1697 = vmax.xlane.f32.xlu1 %v1696_v37 }
0x10b5   : > { %v1695_v38 = vpop.xlane.xlu1 %1694 }
0x10b6   : > { %v1699_v19 = vsub.f32 %v1687_v30, %v1695_v38 }
0x10b8   : > { %v1701_v40 = vmul.f32 1.442695, %v1699_v19 }
0x10b9   : > { %v1698_v39 = vpop.xlane.xlu1 %1697 }
0x10ba   : > { %3235 = vpow2.f32 %v1701_v40  ;;  %v1700_v6 = vsub.f32 %v1690_v35, %v1698_v39 }
0x10bc   : > { %v1703_v41 = vmul.f32 1.442695, %v1700_v6 }
0x10be   : > { %3237 = vpow2.f32 %v1703_v41 }
0x10c7   : > { %v3236_v42 = vpop.eup %3235 }
0x10c8   : > { %v1705_v43 = vsel %vm566_vm5, %v3236_v42, 0.0 }
0x10c9   : > { %1706 = vadd.xlane.f32.xlu1 %v1705_v43 }
0x10cb   : > { %v3238_v44 = vpop.eup %3237 }
0x10cc   : > { %v1708_v45 = vsel %vm566_vm5, %v3238_v44, 0.0 }
0x10cd   : > { %1709 = vadd.xlane.f32.xlu1 %v1708_v45 }
0x10de   : > { %1817 = vrot.lane.b32.xlu1 %v3652_v26, %s3286_s29 }
0x1152   : > { %v1707_v46 = vpop.xlane.xlu1 %1706 }
0x1153   : > { %3239 = vrcp.f32 %v1707_v46 }
0x1156   : > { %v1710_v47 = vpop.xlane.xlu1 %1709 }
0x1157   : > { %3241 = vrcp.f32 %v1710_v47 }
0x115a   : > { %v1818_v52 = vpop.permute.xlu1 %1817 }
0x115b   : > { %v1823_v54 = vsel %vm518_vm2, %v1818_v52, 0 }
0x1160   : > { %v3240_v48 = vpop.eup %3239 }
0x1161   : > { %v1713_v50 = vmul.f32 %v3240_v48, %v3236_v42 }
0x1164   : > { %v3242_v49 = vpop.eup %3241 }
0x1165   : > { %v1714_v51 = vmul.f32 %v3242_v49, %v3238_v44  ;;  %v2782_v44 = vld [vmem:[%s3858_s2 + $0x14] sm:$0xf] }
0x1166   : > { %v1944_v45 = vsel %vm640_vm6, %v2782_v44, 0 }
0x1167   : > { %v1715_v53 = vpack.c.bf16 %v1714_v51, %v1713_v50 }
0x1169   : > { %3064 = vmatmul.mubr.msk.bf16.vlgmr.msra.gmra.mxu0 %vm566_vm5, %v1715_v53 }
0x116a   : > { %3074 = vmatpush3.bf16.xpose.msra.mxu0 %v1823_v54  ;;  %3075 = vmatprep.mubr.msk.bf16.mxu0 %vm3284_vm0, %v3283_v1 }
0x116b   : > { %3085 = vmatprep.subr.bf16.mxu0 %v3283_v1 }
0x1171   : > { %3076 = vmatmul.mubr.msk.bf16.vlgmr.msra.gmra.mxu0 %vm518_vm2, %v1815_v55 }
0x1172   : > { %3087 = vmatprep.mubr.msk.bf16.mxu0 %vm3284_vm0, %v3283_v1  ;;  %3086 = vmatpush3.bf16.msra.mxu0 %v1944_v45 }
0x1173   : > { %3097 = vmatprep.subr.bf16.mxu0 %v3283_v1 }
0x1229   : > { %v1754_v61 = vpop.f32.mrf.mxu0 }
0x122b   : > { %v3065_v62 = vpop.f32.mrf.mxu0 }
0x122d   : > { %v1757_v63 = vpop.f32.mrf.mxu0 }
0x122e   : > { %v1761_v0 = vpack.c.bf16 %v1757_v63, %v1754_v61 }
0x122f   : > { %v3066_v2 = vpop.f32.mrf.mxu0 }
0x1230   : > { %3070 = vmatmul.mubr.msk.bf16.vlgmr.msra.gmra.mxu1 %vm518_vm2, %v1761_v0 }
0x1231   : > { %v1859_v3 = vpop.f32.mrf.mxu0  ;;  %3081 = vmatprep.mubr.msk.bf16.mxu1 %vm3284_vm0, %v3283_v1 }
0x1232   : > { %v1860_v4 = vadd.f32 %v1859_v3, %v3414_v32 }
0x1233   : > { %v3077_v7 = vpop.f32.mrf.mxu0 }
0x1234   : > { %v1866_v8 = vsel %vm566_vm5, %v1860_v4, -inf }
0x1235   : > { %1867 = vmax.xlane.f32.xlu1 %v1866_v8  ;;  %v1862_v9 = vpop.f32.mrf.mxu0 }
0x1236   : > { %v1863_v10 = vadd.f32 %v1862_v9, %v3417_v36 }
0x1237   : > { %v3078_v11 = vpop.f32.mrf.mxu0 }
0x1238   : > { %v1869_v12 = vsel %vm566_vm5, %v1863_v10, -inf }
0x1239   : > { %1870 = vmax.xlane.f32.xlu0 %v1869_v12 }
0x124f   : > { %1991 = vrot.lane.b32.xlu0 %v3652_v26, %s3287_s12 }
0x12be   : > { %v1868_v13 = vpop.xlane.xlu1 %1867 }
0x12bf   : > { %v1872_v14 = vsub.f32 %v1860_v4, %v1868_v13 }
0x12c1   : > { %v1874_v15 = vmul.f32 1.442695, %v1872_v14 }
0x12c2   : > { %v1871_v16 = vpop.xlane.xlu0 %1870 }
0x12c3   : > { %3243 = vpow2.f32 %v1874_v15  ;;  %v1873_v20 = vsub.f32 %v1863_v10, %v1871_v16 }
0x12c5   : > { %v1876_v24 = vmul.f32 1.442695, %v1873_v20 }
0x12c6   : > { %v1992_v41 = vpop.permute.xlu0 %1991 }
0x12c7   : > { %3245 = vpow2.f32 %v1876_v24  ;;  %v1997_v60 = vsel %vm518_vm2, %v1992_v41, 0 }
0x12d0   : > { %v3244_v59 = vpop.eup %3243 }
0x12d1   : > { %v1878_v21 = vsel %vm566_vm5, %v3244_v59, 0.0 }
0x12d2   : > { %1879 = vadd.xlane.f32.xlu1 %v1878_v21 }
0x12d4   : > { %v3246_v22 = vpop.eup %3245 }
0x12d5   : > { %v1881_v23 = vsel %vm566_vm5, %v3246_v22, 0.0 }
0x12d6   : > { %1882 = vadd.xlane.f32.xlu1 %v1881_v23 }
0x12e7   : > { %1890 = vrot.lane.b32.xlu1 %v3643_v18, %s3286_s29  ;;  %s2696_s29 = sshll.u32 %s3866_s28, 3 }
0x12e8   : > { %s303_s18 = scalar_lea.vmem %s3864_s8, %s2696_s29 }
0x12eb   : > { %1989 = vrot.lane.b32.xlu1 %v3641_v17, %s3287_s12 }
0x12f0   : > { %v1804_v29 = vpop.f32.mrf.mxu1 }
0x12f1   : > { %v3701_v30 = vadd.f32 %v1804_v29, %v1642_v27 }
0x12f2   : > { %v3071_v31 = vpop.f32.mrf.mxu1 }
0x12f4   : > { %v1807_v34 = vpop.f32.mrf.mxu1 }
0x12f5   : > { %v3704_v35 = vadd.f32 %v1807_v34, %v1643_v33 }
0x12f6   : > { %v3072_v5 = vpop.f32.mrf.mxu1 }
0x135b   : > { %v1880_v37 = vpop.xlane.xlu1 %1879 }
0x135c   : > { %3247 = vrcp.f32 %v1880_v37 }
0x135f   : > { %v1883_v38 = vpop.xlane.xlu1 %1882 }
0x1360   : > { %3249 = vrcp.f32 %v1883_v38 }
0x1363   : > { %v1891_v19 = vpop.permute.xlu1 %1890 }
0x1364   : > { %3080 = vmatpush3.bf16.msra.mxu1 %v1891_v19 }
0x1365   : > { %3091 = vmatprep.subr.bf16.mxu1 %v3283_v1 }
0x1367   : > { %v1990_v43 = vpop.permute.xlu1 %1989 }
0x1369   : > { %v3248_v40 = vpop.eup %3247 }
0x136a   : > { %v1886_v39 = vmul.f32 %v3248_v40, %v3244_v59 }
0x136d   : > { %v3250_v58 = vpop.eup %3249 }
0x136e   : > { %v1887_v6 = vmul.f32 %v3250_v58, %v3246_v22 }
0x1370   : > { %v1888_v42 = vpack.c.bf16 %v1887_v6, %v1886_v39 }
0x1372   : > { %3082 = vmatmul.mubr.msk.bf16.vlgmr.msra.gmra.mxu1 %vm566_vm5, %v1888_v42 }
0x1373   : > { %3092 = vmatpush3.bf16.xpose.msra.mxu1 %v1997_v60  ;;  %3093 = vmatprep.mubr.msk.bf16.mxu1 %vm3284_vm0, %v3283_v1 }
0x1374   : > { %3103 = vmatprep.subr.bf16.mxu1 %v3283_v1 }
0x137a   : > { %3094 = vmatmul.mubr.msk.bf16.vlgmr.msra.gmra.mxu1 %vm518_vm2, %v1990_v43 }
0x137b   : > { %3105 = vmatprep.mubr.msk.bf16.mxu1 %vm3284_vm0, %v3283_v1 }
0x1432   : > { %v1930_v46 = vpop.f32.mrf.mxu1 }
0x1434   : > { %v3083_v47 = vpop.f32.mrf.mxu1 }
0x1436   : > { %v1933_v48 = vpop.f32.mrf.mxu1 }
0x1437   : > { %v1937_v49 = vpack.c.bf16 %v1933_v48, %v1930_v46 }
0x1438   : > { %v3084_v50 = vpop.f32.mrf.mxu1 }
0x1439   : > { %3088 = vmatmul.mubr.msk.bf16.vlgmr.msra.gmra.mxu0 %vm518_vm2, %v1937_v49 }
0x143a   : > { %v2033_v51 = vpop.f32.mrf.mxu1  ;;  %3099 = vmatprep.mubr.msk.bf16.mxu0 %vm3284_vm0, %v3283_v1 }
0x143b   : > { %v2034_v52 = vadd.f32 %v2033_v51, %v3414_v32 }
0x143c   : > { %v3095_v53 = vpop.f32.mrf.mxu1 }
0x143d   : > { %v2040_v54 = vsel %vm566_vm5, %v2034_v52, -inf }
0x143e   : > { %2041 = vmax.xlane.f32.xlu1 %v2040_v54  ;;  %v2036_v55 = vpop.f32.mrf.mxu1 }
0x143f   : > { %v2037_v56 = vadd.f32 %v2036_v55, %v3417_v36 }
0x1440   : > { %v3096_v57 = vpop.f32.mrf.mxu1 }
0x1441   : > { %v2043_v61 = vsel %vm566_vm5, %v2037_v56, -inf }
0x1442   : > { %2044 = vmax.xlane.f32.xlu0 %v2043_v61 }
0x14c7   : > { %v2042_v62 = vpop.xlane.xlu1 %2041 }
0x14c8   : > { %v2046_v63 = vsub.f32 %v2034_v52, %v2042_v62 }
0x14ca   : > { %v2048_v0 = vmul.f32 1.442695, %v2046_v63 }
0x14cb   : > { %v2045_v2 = vpop.xlane.xlu0 %2044 }
0x14cc   : > { %3251 = vpow2.f32 %v2048_v0  ;;  %v2047_v3 = vsub.f32 %v2037_v56, %v2045_v2 }
0x14ce   : > { %v2050_v4 = vmul.f32 1.442695, %v2047_v3  ;;  %v2790_v3 = vld [vmem:[%s3858_s2 + $0x1c] sm:$0xf] }
0x14d0   : > { %3253 = vpow2.f32 %v2050_v4  ;;  %v2290_v4 = vsel %vm640_vm6, %v2790_v3, 0 }
0x14d9   : > { %v3252_v7 = vpop.eup %3251 }
0x14da   : > { %v2052_v8 = vsel %vm566_vm5, %v3252_v7, 0.0 }
0x14db   : > { %2053 = vadd.xlane.f32.xlu0 %v2052_v8 }
0x14dd   : > { %v3254_v9 = vpop.eup %3253 }
0x14de   : > { %v2055_v10 = vsel %vm566_vm5, %v3254_v9, 0.0 }
0x14df   : > { %2056 = vadd.xlane.f32.xlu1 %v2055_v10 }
0x14f0   : > { %2164 = vrot.lane.b32.xlu1 %v3652_v26, %s3288_s15 }
0x14f1   : > { %2063 = vrot.lane.b32.xlu0 %v3643_v18, %s3287_s12 }
0x14f4   : > { %2162 = vrot.lane.b32.xlu1 %v3641_v17, %s3288_s15 }
0x14f9   : > { %v1980_v11 = vpop.f32.mrf.mxu0 }
0x14fa   : > { %v3736_v12 = vadd.f32 %v1980_v11, %v3701_v30  ;;  %v2786_v30 = vld [vmem:[%s3858_s2 + $0x18] sm:$0xf] }
0x14fb   : > { %v3089_v13 = vpop.f32.mrf.mxu0  ;;  %v2117_v31 = vsel %vm640_vm6, %v2786_v30, 0 }
0x14fc   : > { %3104 = vmatpush3.bf16.msra.mxu1 %v2117_v31 }
0x14fd   : > { %v1983_v14 = vpop.f32.mrf.mxu0  ;;  %3115 = vmatprep.subr.bf16.mxu1 %v3283_v1 }
0x14fe   : > { %v3739_v15 = vadd.f32 %v1983_v14, %v3704_v35 }
0x14ff   : > { %v3090_v16 = vpop.f32.mrf.mxu0 }
0x1564   : > { %v2054_v20 = vpop.xlane.xlu0 %2053 }
0x1565   : > { %3255 = vrcp.f32 %v2054_v20 }
0x1568   : > { %v2057_v24 = vpop.xlane.xlu1 %2056  ;;  %v2064_v26 = vpop.permute.xlu0 %2063 }
0x1569   : > { %3257 = vrcp.f32 %v2057_v24  ;;  %3098 = vmatpush3.bf16.msra.mxu0 %v2064_v26 }
0x156a   : > { %3109 = vmatprep.subr.bf16.mxu0 %v3283_v1 }
0x156c   : > { %v2165_v23 = vpop.permute.xlu1 %2164 }
0x156d   : > { %v2170_v27 = vsel %vm518_vm2, %v2165_v23, 0 }
0x1570   : > { %v2163_v29 = vpop.permute.xlu1 %2162 }
0x1572   : > { %v3256_v59 = vpop.eup %3255 }
0x1573   : > { %v2060_v21 = vmul.f32 %v3256_v59, %v3252_v7 }
0x1576   : > { %v3258_v17 = vpop.eup %3257 }
0x1577   : > { %v2061_v22 = vmul.f32 %v3258_v17, %v3254_v9 }
0x1579   : > { %v2062_v25 = vpack.c.bf16 %v2061_v22, %v2060_v21 }
0x157b   : > { %3100 = vmatmul.mubr.msk.bf16.vlgmr.msra.gmra.mxu0 %vm566_vm5, %v2062_v25 }
0x157c   : > { %3110 = vmatpush3.bf16.xpose.msra.mxu0 %v2170_v27  ;;  %3111 = vmatprep.mubr.msk.bf16.mxu0 %vm3284_vm0, %v3283_v1 }
0x157d   : > { %3121 = vmatprep.subr.bf16.mxu0 %v3283_v1 }
0x1583   : > { %3112 = vmatmul.mubr.msk.bf16.vlgmr.msra.gmra.mxu0 %vm518_vm2, %v2163_v29 }
0x1584   : > { %3123 = vmatprep.mubr.msk.bf16.mxu0 %vm3284_vm0, %v3283_v1  ;;  %3122 = vmatpush3.bf16.msra.mxu0 %v2290_v4 }
0x1585   : > { %3135 = vmatprep.subr.bf16.mxu0 %v3283_v1 }
0x163b   : > { %v2103_v33 = vpop.f32.mrf.mxu0 }
0x163d   : > { %v3101_v34 = vpop.f32.mrf.mxu0 }
0x163e   : > { %v3188_v34 = vld [vmem:[%s3859_s3 + $0x10] sm:$0xff]  }
0x163f   : > { %v2106_v35 = vpop.f32.mrf.mxu0 }
0x1640   : > { %v2110_v5 = vpack.c.bf16 %v2106_v35, %v2103_v33  ;;  %v3187_v33 = vld [vmem:[%s3859_s3 + $0x18] sm:$0xff]  }
0x1641   : > { %v3102_v37 = vpop.f32.mrf.mxu0  ;;  %v3189_v35 = vld [vmem:[%s3860_s4 + $0x38] sm:$0xff]  }
0x1642   : > { %3106 = vmatmul.mubr.msk.bf16.vlgmr.msra.gmra.mxu1 %vm518_vm2, %v2110_v5 }
0x1643   : > { %v2206_v38 = vpop.f32.mrf.mxu0  ;;  %3117 = vmatprep.mubr.msk.bf16.mxu1 %vm3284_vm0, %v3283_v1 }
0x1644   : > { %v2207_v19 = vadd.f32 %v2206_v38, %v3414_v32 }
0x1645   : > { %v3113_v40 = vpop.f32.mrf.mxu0 }
0x1646   : > { %v2213_v58 = vsel %vm566_vm5, %v2207_v19, -inf }
0x1647   : > { %2214 = vmax.xlane.f32.xlu0 %v2213_v58  ;;  %v2209_v39 = vpop.f32.mrf.mxu0 }
0x1648   : > { %v2210_v6 = vadd.f32 %v2209_v39, %v3417_v36 }
0x1649   : > { %v3114_v41 = vpop.f32.mrf.mxu0 }
0x164a   : > { %v2216_v42 = vsel %vm566_vm5, %v2210_v6, -inf  ;;  %v2794_v41 = vld [vmem:[%s3861_s5 + $0x14] ss:$0 sm:$0xff] }
0x164b   : > { %2217 = vmax.xlane.f32.xlu1 %v2216_v42 }
0x165c   : > { %2236 = vrot.lane.b32.xlu1 %v3643_v18, %s3288_s15 }
0x16d0   : > { %v2215_v60 = vpop.xlane.xlu0 %2214 }
0x16d1   : > { %v2219_v43 = vsub.f32 %v2207_v19, %v2215_v60 }
0x16d3   : > { %v2221_v44 = vmul.f32 1.442695, %v2219_v43 }
0x16d4   : > { %v2218_v45 = vpop.xlane.xlu1 %2217 }
0x16d5   : > { %3259 = vpow2.f32 %v2221_v44  ;;  %v2220_v32 = vsub.f32 %v2210_v6, %v2218_v45  ;;  %v2795_v44 = vld [vmem:[%s3861_s5 + $0x15] ss:$0 sm:$0xff] }
0x16d7   : > { %v2223_v46 = vmul.f32 1.442695, %v2220_v32 }
0x16d8   : > { %v2237_v47 = vpop.permute.xlu1 %2236 }
0x16d9   : > { %3261 = vpow2.f32 %v2223_v46  ;;  %3116 = vmatpush3.bf16.msra.mxu1 %v2237_v47 }
0x16da   : > { %3127 = vmatprep.subr.bf16.mxu1 %v3283_v1 }
0x16e2   : > { %v3260_v36 = vpop.eup %3259 }
0x16e3   : > { %v2225_v48 = vsel %vm566_vm5, %v3260_v36, 0.0 }
0x16e4   : > { %2226 = vadd.xlane.f32.xlu0 %v2225_v48  ;;  %v3191_v48 = vld [vmem:[%s3860_s4 + $0x28] sm:$0xff]  }
0x16e6   : > { %v3262_v49 = vpop.eup %3261 }
0x16e7   : > { %v2228_v50 = vsel %vm566_vm5, %v3262_v49, 0.0 }
0x16e8   : > { %2229 = vadd.xlane.f32.xlu0 %v2228_v50  ;;  %v2801_v50 = vld [vmem:[%s3861_s5 + $0x18] ss:$0 sm:$0xff] }
0x1702   : > { %v2153_v18 = vpop.f32.mrf.mxu1 }
0x1703   : > { %v2160_v51 = vadd.f32 %v2153_v18, %v3736_v12 }
0x1704   : > { %v3107_v52 = vpop.f32.mrf.mxu1 }
0x1706   : > { %v2156_v53 = vpop.f32.mrf.mxu1 }
0x1707   : > { %v2161_v54 = vadd.f32 %v2156_v53, %v3739_v15 }
0x1708   : > { %v3108_v55 = vpop.f32.mrf.mxu1 }
0x176d   : > { %v2227_v56 = vpop.xlane.xlu0 %2226 }
0x176e   : > { %3263 = vrcp.f32 %v2227_v56 }
0x1771   : > { %v2230_v57 = vpop.xlane.xlu0 %2229 }
0x1772   : > { %3265 = vrcp.f32 %v2230_v57 }
0x177b   : > { %v3264_v61 = vpop.eup %3263 }
0x177c   : > { %v2233_v63 = vmul.f32 %v3264_v61, %v3260_v36  ;;  %v3190_v36 = vld [vmem:[%s3860_s4 + $0x30] sm:$0xff]  }
0x177f   : > { %v3266_v62 = vpop.eup %3265 }
0x1780   : > { %v2234_v0 = vmul.f32 %v3266_v62, %v3262_v49  ;;  %v3192_v49 = vld [vmem:[%s3860_s4 + $0x20] sm:$0xff]  }
0x1782   : > { %v2235_v2 = vpack.c.bf16 %v2234_v0, %v2233_v63  ;;  %v2814_v0 = vld [vmem:[%s3861_s5 + $0x19] ss:$0 sm:$0xff] }
0x1784   : > { %3118 = vmatmul.mubr.msk.bf16.vlgmr.msra.gmra.mxu1 %vm566_vm5, %v2235_v2 }
0x1785   : > { %3131 = vmatprep.mubr.msk.bf16.mxu1 %vm3284_vm0, %v3283_v1  ;;  %3128 = vmatpush3.bf16.msra.mxu1 %v3187_v33  ;;  %v3194_v33 = vld [vmem:[%s3863_s7] sm:$0xff]  }
0x1786   : > { %3129 = vmatprep.subr.bf16.mxu1 %v3283_v1 }
0x1789   : > { %3130 = vmatpush3.bf16.msra.mxu1 %v3188_v34 }
0x178a   : > { %3147 = vmatprep.subr.bf16.mxu1 %v3283_v1 }
0x1844   : > { %v2276_v7 = vpop.f32.mrf.mxu1 }
0x1846   : > { %v3119_v8 = vpop.f32.mrf.mxu1 }
0x1848   : > { %v2279_v9 = vpop.f32.mrf.mxu1 }
0x1849   : > { %v2283_v10 = vpack.c.bf16 %v2279_v9, %v2276_v7 }
0x184a   : > { %v3120_v11 = vpop.f32.mrf.mxu1 }
0x184b   : > { %3124 = vmatmul.mubr.msk.bf16.vlgmr.msra.gmra.mxu0 %vm518_vm2, %v2283_v10 }
0x184c   : > { %3143 = vmatprep.mubr.msk.bf16.mxu0 %vm3284_vm0, %v3283_v1  ;;  %3136 = vmatpush3.bf16.msra.mxu0 %v3189_v35 }
0x184d   : > { %3137 = vmatprep.subr.bf16.mxu0 %v3283_v1 }
0x1850   : > { %3138 = vmatpush3.bf16.msra.mxu0 %v3190_v36 }
0x1851   : > { %3139 = vmatprep.subr.bf16.mxu0 %v3283_v1 }
0x1854   : > { %3140 = vmatpush3.bf16.msra.mxu0 %v3191_v48 }
0x1855   : > { %3141 = vmatprep.subr.bf16.mxu0 %v3283_v1 }
0x1858   : > { %3142 = vmatpush3.bf16.msra.mxu0 %v3192_v49 }
0x190b   : > { %v2326_v12 = vpop.f32.mrf.mxu0 }
0x190c   : > { %v2333_v13 = vadd.f32 %v2326_v12, %v2160_v51 }
0x190d   : > { %v3125_v14 = vpop.f32.mrf.mxu0 }
0x190e   : > { %v2337_v15 = vsel %vm338_vm1, %v2333_v13, 0.0 }
0x190f   : > { %2338 = vadd.xlane.f32.xlu0 %v2337_v15  ;;  %v2329_v16 = vpop.f32.mrf.mxu0 }
0x1910   : > { %v2334_v20 = vadd.f32 %v2329_v16, %v2161_v54 }
0x1911   : > { %v3126_v24 = vpop.f32.mrf.mxu0 }
0x1912   : > { %v2340_v26 = vsel %vm338_vm1, %v2334_v20, 0.0  ;;  %v2822_v24 = vld [vmem:[%s3861_s5 + $0x16] ss:$0 sm:$0xff] }
0x1913   : > { %2341 = vadd.xlane.f32.xlu0 %v2340_v26 }
0x1998   : > { %v2339_v59 = vpop.xlane.xlu0 %2338 }
0x1999   : > { %v2343_v17 = vmul.f32 0.03125, %v2339_v59  ;;  %v2823_v59 = vld [vmem:[%s3861_s5 + $0x17] ss:$0 sm:$0xff] }
0x199b   : > { %v2345_v21 = vsub.f32 %v2333_v13, %v2343_v17 }
0x199c   : > { %v2342_v22 = vpop.xlane.xlu0 %2341 }
0x199d   : > { %v2344_v23 = vmul.f32 0.03125, %v2342_v22  ;;  %v2347_v25 = vmul.f32 %v2345_v21, %v2345_v21 }
0x199f   : > { %v2346_v27 = vsub.f32 %v2334_v20, %v2344_v23  ;;  %v2349_v29 = vsel %vm338_vm1, %v2347_v25, 0.0 }
0x19a0   : > { %2350 = vadd.xlane.f32.xlu0 %v2349_v29 }
0x19a1   : > { %v2348_v30 = vmul.f32 %v2346_v27, %v2346_v27 }
0x19a3   : > { %v2352_v31 = vsel %vm338_vm1, %v2348_v30, 0.0 }
0x19a4   : > { %2353 = vadd.xlane.f32.xlu0 %v2352_v31  ;;  %v3193_v31 = vld [vmem:[%s3863_s7 + $0x8] sm:$0xff]  }
0x1a29   : > { %v2351_v5 = vpop.xlane.xlu0 %2350 }
0x1a2a   : > { %v2355_v37 = vmul.f32 0.03125, %v2351_v5 }
0x1a2c   : > { %v2357_v38 = vadd.f32 1e-05, %v2355_v37 }
0x1a2d   : > { %v2354_v19 = vpop.xlane.xlu0 %2353 }
0x1a2e   : > { %3267 = vrsqrt.f32 %v2357_v38  ;;  %v2356_v40 = vmul.f32 0.03125, %v2354_v19  ;;  %v2552_v38 = vld [vmem:[%s3862_s6] sm:$0x1] }
0x1a30   : > { %v2358_v58 = vadd.f32 1e-05, %v2356_v40  ;;  %v2553_v40 = vld [vmem:[%s3862_s6 + $0x1] sm:$0x1] }
0x1a32   : > { %3269 = vrsqrt.f32 %v2358_v58 }
0x1a3b   : > { %v3268_v39 = vpop.eup %3267 }
0x1a3c   : > { %v2361_v6 = vmul.f32 %v3268_v39, %v2345_v21 }
0x1a3e   : > { %v2367_v43 = vmul.f32 %v2794_v41, %v2361_v6 }
0x1a3f   : > { %v3270_v42 = vpop.eup %3269 }
0x1a40   : > { %v2362_v60 = vmul.f32 %v3270_v42, %v2346_v27  ;;  %v2373_v32 = vadd.f32 %v2795_v44, %v2367_v43 }
0x1a42   : > { %v2368_v45 = vmul.f32 %v2794_v41, %v2362_v60  ;;  %v2633_v41 = vsub.s32 0, %v3410_v28 }
0x1a44   : > { %v2374_v46 = vadd.f32 %v2795_v44, %v2368_v45 }
0x1a46   : > { %v2375_v47 = vpack.c.bf16 %v2374_v46, %v2373_v32 }
0x1a48   : > { %3132 = vmatmul.mubr.msk.bf16.vlgmr.msra.gmra.mxu1 %vm338_vm1, %v2375_v47 }
0x1a49   : > { %3151 = vmatprep.mubr.msk.bf16.mxu1 %vm3284_vm0, %v3283_v1  ;;  %3148 = vmatpush3.bf16.msra.mxu1 %v3193_v31 }
0x1a4a   : > { %3149 = vmatprep.subr.bf16.mxu1 %v3283_v1  ;;  %v2575_v1 = vld [vmem:[%s3862_s6 + $0x2] sm:$0x1] }
0x1a4d   : > { %3150 = vmatpush3.bf16.msra.mxu1 %v3194_v33 }
0x1b08   : > { %v2435_v18 = vpop.f32.mrf.mxu1 }
0x1b09   : > { %v2436_v52 = vadd.f32 %v2801_v50, %v2435_v18 }
0x1b0a   : > { %v3133_v51 = vpop.f32.mrf.mxu1 }
0x1b0b   : > { %v2442_v56 = vmax.f32 %v2436_v52, 0.0 }
0x1b0c   : > { %v2438_v53 = vpop.f32.mrf.mxu1 }
0x1b0d   : > { %v2439_v54 = vadd.f32 %v2801_v50, %v2438_v53 }
0x1b0e   : > { %v3134_v55 = vpop.f32.mrf.mxu1 }
0x1b0f   : > { %v2443_v57 = vmax.f32 %v2439_v54, 0.0 }
0x1b11   : > { %v2444_v61 = vpack.c.bf16 %v2443_v57, %v2442_v56 }
0x1b13   : > { %3144 = vmatmul.mubr.msk.bf16.vlgmr.msra.gmra.mxu0 %vm1356_vm7, %v2444_v61 }
0x1bd3   : > { %v2520_v62 = vpop.f32.mrf.mxu0 }
0x1bd5   : > { %v3145_v63 = vpop.f32.mrf.mxu0 }
0x1bd7   : > { %v2522_v2 = vpop.f32.mrf.mxu0 }
0x1bd8   : > { %v2523_v3 = vadd.f32 %v2814_v0, %v2522_v2 }
0x1bd9   : > { %v3146_v4 = vpop.f32.mrf.mxu0 }
0x1bda   : > { %v2526_v7 = vadd.f32 %v2523_v3, %v2374_v46 }
0x1bdc   : > { %v2529_v8 = vsel %vm338_vm1, %v2526_v7, 0.0 }
0x1bdd   : > { %2530 = vadd.xlane.f32.xlu0 %v2529_v8 }
0x1c66   : > { %v2531_v9 = vpop.xlane.xlu0 %2530 }
0x1c67   : > { %v2532_v10 = vmul.f32 0.03125, %v2531_v9 }
0x1c69   : > { %v2533_v11 = vsub.f32 %v2526_v7, %v2532_v10 }
0x1c6b   : > { %v2534_v12 = vmul.f32 %v2533_v11, %v2533_v11 }
0x1c6d   : > { %v2535_v13 = vsel %vm338_vm1, %v2534_v12, 0.0 }
0x1c6e   : > { %2536 = vadd.xlane.f32.xlu1 %v2535_v13 }
0x1cf7   : > { %v2537_v14 = vpop.xlane.xlu1 %2536 }
0x1cf8   : > { %v2538_v15 = vmul.f32 0.03125, %v2537_v14 }
0x1cfa   : > { %v2539_v16 = vadd.f32 1e-05, %v2538_v15 }
0x1cfc   : > { %3271 = vrsqrt.f32 %v2539_v16 }
0x1d09   : > { %v3272_v20 = vpop.eup %3271 }
0x1d0a   : > { %v2541_v26 = vmul.f32 %v3272_v20, %v2533_v11 }
0x1d0c   : > { %v2546_v17 = vmul.f32 %v2822_v24, %v2541_v26 }
0x1d0e   : > { %v2551_v21 = vadd.f32 %v2823_v59, %v2546_v17 }
0x1d10   : > { %v2555_v22 = vsel %vm2554_vm8, %v2551_v21, 0.0 }
0x1d11   : > { %2556 = vadd.xlane.f32.xlu0 %v2555_v22 }
0x1d9a   : > { %v2557_v23 = vpop.xlane.xlu0 %2556 }
0x1d9b   : > { %v2558_v25 = vmul.f32 0.03125, %v2557_v23 }
0x1d9d   : > { %v2559_v27 = vsub.f32 %v2551_v21, %v2558_v25 }
0x1d9f   : > { %v2560_v29 = vmul.f32 %v2559_v27, %v2559_v27 }
0x1da1   : > { %v2561_v30 = vsel %vm2554_vm8, %v2560_v29, 0.0 }
0x1da2   : > { %2562 = vadd.xlane.f32.xlu0 %v2561_v30 }
0x1e2b   : > { %v2563_v34 = vpop.xlane.xlu0 %2562 }
0x1e2c   : > { %v2564_v35 = vmul.f32 0.03125, %v2563_v34 }
0x1e2e   : > { %v2565_v5 = vadd.f32 1e-05, %v2564_v35 }
0x1e30   : > { %3273 = vrsqrt.f32 %v2565_v5 }
0x1e3d   : > { %v3274_v37 = vpop.eup %3273 }
0x1e3e   : > { %v2567_v19 = vmul.f32 %v3274_v37, %v2559_v27 }
0x1e40   : > { %v2568_v58 = vmul.f32 %v2567_v19, %v2552_v38 }
0x1e42   : > { %v2569_v39 = vadd.f32 %v2568_v58, %v2553_v40 }
0x1e44   : > { %v2570_v6 = vpack.c.bf16 %v2569_v39, %v2569_v39 }
0x1e46   : > { %3152 = vmatmul.mubr.msk.bf16.vlgmr.msra.gmra.mxu1 %vm338_vm1, %v2570_v6 }
0x1f06   : > { %v2625_v42 = vpop.f32.mrf.mxu1 }
0x1f07   : > { %v2626_v60 = vadd.f32 %v2625_v42, %v2575_v1 }
0x1f08   : > { %v3153_v43 = vpop.f32.mrf.mxu1 }
0x1f09   : > { %v2634_v44 = vrot.slane %v2626_v60, %v2633_v41 }
0x1f0a   : > { %v2628_v45 = vpop.f32.mrf.mxu1 }
0x1f0b   : > { %2635 = vst [vmem:[%s303_s18] sm:$0xff] %v2634_v44 }
0x1f0c   : > { %v3154_v32 = vpop.f32.mrf.mxu1 }
0x1f0d PF: > { %s18_s27 = sadd.s32 1, %s3281_s27  }
0x1f0e   : > { %p15_p4 = scmp.ge.s32.totalorder %s18_s27, 4  }
0x1f10   :  { %17 = sbr.rel (!%p15_p4) target bundleno = 1 (0x1), region = 97 }

</bundles_post_ra>
